<compile_context>
chip_gen: v7x
topology: tpu7x:2x2x1
jax: 0.10.0
libtpu: 0.0.40
codegen_flags: <defaults>
</compile_context>

<pallas_src>
import jax
import jax.numpy as jnp
from jax.experimental import pallas as pl
from jax.experimental.pallas import tpu as pltpu


def _make_fused_kernel(H: int, W: int):
    HW = H * W

    def kernel(x_ref, w1_ref, b1_ref, w2_ref, b2_ref, o_ref):
        # x_ref : (1, Cin, HW)      input, spatial flattened row-major (lane axis = HW)
        # w1_ref: (C1, 9*Cin)       conv1 weights, tap-major columns (t*Cin + c)
        # b1_ref: (C1, 1)
        # w2_ref: (Cout, 9*C1)      conv2 weights, tap-major columns
        # b2_ref: (Cout, 1)
        # o_ref : (1, Cout, HW)     output (reshapes directly to NCHW in the wrapper)

        # Column index of every flattened pixel; used to zero the horizontal wrap of
        # the +/-1 x-shifts (implicit zero padding).
        col = jax.lax.broadcasted_iota(jnp.int32, (1, HW), 1) % W
        not_first_col = col != 0          # valid positions for dx = -1
        not_last_col = col != (W - 1)     # valid positions for dx = +1

        def tap_shift(a, dy, dx):
            # result[:, y*W + x] = a[:, (y+dy)*W + (x+dx)], zero when out of bounds.
            s = dy * W + dx
            C = a.shape[0]
            if s > 0:
                sh = jnp.concatenate(
                    [a[:, s:], jnp.zeros((C, s), a.dtype)], axis=1)
            elif s < 0:
                sh = jnp.concatenate(
                    [jnp.zeros((C, -s), a.dtype), a[:, :HW + s]], axis=1)
            else:
                sh = a
            # Vertical out-of-bounds is already zero from the flat shift (only the
            # corner cases leak, and those are exactly the column-masked positions).
            if dx == 1:
                sh = jnp.where(not_last_col, sh, 0.0)
            elif dx == -1:
                sh = jnp.where(not_first_col, sh, 0.0)
            return sh

        def im2col(a):
            # (C, HW) -> (9*C, HW), tap-major rows: row = (ky*3 + kx)*C + c
            return jnp.concatenate(
                [tap_shift(a, dy, dx) for dy in (-1, 0, 1) for dx in (-1, 0, 1)],
                axis=0)

        x = x_ref[0]                                            # (Cin, HW)

        # conv1: one K=9*Cin matmul on the MXU, f32 accumulation.
        p1 = im2col(x)                                          # (9*Cin, HW)
        h = jnp.dot(w1_ref[...], p1,
                    preferred_element_type=jnp.float32) + b1_ref[...]   # (C1, HW) f32

        # conv_out: one K=9*C1 matmul; intermediate h stays on-chip.
        p2 = im2col(h)                                          # (9*C1, HW)
        y = jnp.dot(w2_ref[...], p2,
                    preferred_element_type=jnp.float32) + b2_ref[...]   # (Cout, HW)

        o_ref[0] = y.astype(o_ref.dtype)

    return kernel


def simple_convs_fused(x_nchw, w1_flat, b1_col, w2_flat, b2_col):
    """Fused conv_out(conv1(x)). x_nchw: (N, Cin, H, W); weights pre-flattened (O, 9*I)."""
    N, Cin, H, W = x_nchw.shape
    C1 = w1_flat.shape[0]
    Cout = w2_flat.shape[0]
    HW = H * W

    x_flat = x_nchw.reshape(N, Cin, HW)   # NCHW flattens row-major -> lane axis = H*W

    out = pl.pallas_call(
        _make_fused_kernel(H, W),
        out_shape=jax.ShapeDtypeStruct((N, Cout, HW), x_nchw.dtype),
        grid_spec=pltpu.PrefetchScalarGridSpec(
            num_scalar_prefetch=0,
            grid=(N,),
            in_specs=[
                pl.BlockSpec((1, Cin, HW), lambda n: (n, 0, 0)),
                pl.BlockSpec((C1, 9 * Cin), lambda n: (0, 0)),
                pl.BlockSpec((C1, 1), lambda n: (0, 0)),
                pl.BlockSpec((Cout, 9 * C1), lambda n: (0, 0)),
                pl.BlockSpec((Cout, 1), lambda n: (0, 0)),
            ],
            out_specs=pl.BlockSpec((1, Cout, HW), lambda n: (n, 0, 0)),
        ),
        compiler_params=pltpu.CompilerParams(
            dimension_semantics=("parallel",)),
    )(x_flat, w1_flat, b1_col, w2_flat, b2_col)

    return out.reshape(N, Cout, H, W)     # already channel-first -> plain NCHW reshape


class SimpleConvsPallas:
    """JAX/Pallas port of SimpleConvs: conv_out(conv1(x)), both 3x3 s1 p1 with bias."""

    def __init__(self, in_channels: int, out_channels: int, inter_channels: int = 64,
                 key=jax.random.PRNGKey(0)):
        k1, k2, k3, k4 = jax.random.split(key, 4)
        fan1 = in_channels * 9
        fan2 = inter_channels * 9
        bnd1 = 1.0 / jnp.sqrt(fan1)
        bnd2 = 1.0 / jnp.sqrt(fan2)
        self.w1 = jax.random.uniform(k1, (inter_channels, in_channels, 3, 3),
                                     jnp.float32, -bnd1, bnd1)
        self.bias1 = jax.random.uniform(k2, (inter_channels,), jnp.float32, -bnd1, bnd1)
        self.w2 = jax.random.uniform(k3, (out_channels, inter_channels, 3, 3),
                                     jnp.float32, -bnd2, bnd2)
        self.bias2 = jax.random.uniform(k4, (out_channels,), jnp.float32, -bnd2, bnd2)

        # Hoisted glue (done once, not per forward): OIHW -> (O, KH, KW, I) -> (O, 9*I),
        # i.e. column index = (ky*3 + kx)*Cin + c, matching the kernel's tap-major im2col.
        self.w1_flat = jnp.transpose(self.w1, (0, 2, 3, 1)).reshape(
            inter_channels, 9 * in_channels)
        self.w2_flat = jnp.transpose(self.w2, (0, 2, 3, 1)).reshape(
            out_channels, 9 * inter_channels)
        self.b1_col = self.bias1.reshape(inter_channels, 1)
        self.b2_col = self.bias2.reshape(out_channels, 1)

    def __call__(self, x_nchw):
        return simple_convs_fused(x_nchw, self.w1_flat, self.b1_col,
                                  self.w2_flat, self.b2_col)


def _reference(x_nchw, mod: SimpleConvsPallas):
    """Pure-JAX reference using lax.conv_general_dilated (NCHW, OIHW)."""
    dn = jax.lax.conv_dimension_numbers(x_nchw.shape, mod.w1.shape, ("NCHW", "OIHW", "NCHW"))
    h = jax.lax.conv_general_dilated(x_nchw, mod.w1, (1, 1), ((1, 1), (1, 1)),
                                     dimension_numbers=dn)
    h = h + mod.bias1[None, :, None, None]
    dn2 = jax.lax.conv_dimension_numbers(h.shape, mod.w2.shape, ("NCHW", "OIHW", "NCHW"))
    y = jax.lax.conv_general_dilated(h, mod.w2, (1, 1), ((1, 1), (1, 1)),
                                     dimension_numbers=dn2)
    return y + mod.bias2[None, :, None, None]


if __name__ == "__main__":
    key = jax.random.PRNGKey(0)
    kx, kp = jax.random.split(key)

    # Small shapes consistent with the module: batch=2, in_channels=4, 16x16 spatial,
    # inter_channels=64 (module default), out_channels=8.
    N, Cin, H, W = 2, 4, 16, 16
    Cout = 8
    x = jax.random.normal(kx, (N, Cin, H, W), jnp.float32)

    model = SimpleConvsPallas(in_channels=Cin, out_channels=Cout, inter_channels=64, key=kp)

    out = model(x)
    out = jax.block_until_ready(out)

    ref = jax.block_until_ready(_reference(x, model))
    assert out.shape == (N, Cout, H, W), out.shape
    assert jnp.allclose(out, ref, atol=1e-4, rtol=1e-4), float(jnp.max(jnp.abs(out - ref)))

    print("KERNEL_OK")
</pallas_src>

<mosaic_0001>
module attributes {stable_mosaic.version = 11 : i64} {
  func.func @kernel(%arg0: i32, %arg1: memref<1x4x256xf32, #tpu.memory_space<vmem>>, %arg2: memref<64x36xf32, #tpu.memory_space<vmem>>, %arg3: memref<64x1xf32, #tpu.memory_space<vmem>>, %arg4: memref<8x576xf32, #tpu.memory_space<vmem>>, %arg5: memref<8x1xf32, #tpu.memory_space<vmem>>, %arg6: memref<1x8x256xf32, #tpu.memory_space<vmem>>) attributes {dimension_semantics = [#tpu.dimension_semantics<parallel>], iteration_bounds = array<i64: 2>, scalar_prefetch = 0 : i64, scratch_operands = 0 : i64, tpu.core_type = #tpu.core_type<tc>, window_params = [{transform_indices = @transform_0, window_bounds = array<i64: 1, 4, 256>}, {pipeline_mode = #tpu.pipeline_mode<synchronous>, transform_indices = @transform_1, window_bounds = array<i64: 64, 36>}, {pipeline_mode = #tpu.pipeline_mode<synchronous>, transform_indices = @transform_2, window_bounds = array<i64: 64, 1>}, {pipeline_mode = #tpu.pipeline_mode<synchronous>, transform_indices = @transform_3, window_bounds = array<i64: 8, 576>}, {pipeline_mode = #tpu.pipeline_mode<synchronous>, transform_indices = @transform_4, window_bounds = array<i64: 8, 1>}, {transform_indices = @transform_5, window_bounds = array<i64: 1, 8, 256>}]} {
    %0 = tpu.iota {dimensions = array<i32: 1>} : vector<1x256xi32>
    %c16_i32 = arith.constant 16 : i32
    %c0_i32 = arith.constant 0 : i32
    %1 = arith.cmpi eq, %c16_i32, %c0_i32 : i32
    %c1_i32 = arith.constant 1 : i32
    %2 = arith.select %1, %c1_i32, %c16_i32 : i32
    %3 = vector.broadcast %2 : i32 to vector<1x256xi32>
    %4 = arith.remsi %0, %3 : vector<1x256xi32>
    %c0_i32_0 = arith.constant 0 : i32
    %5 = vector.broadcast %c0_i32_0 : i32 to vector<1x256xi32>
    %6 = arith.cmpi ne, %4, %5 : vector<1x256xi32>
    %c0_i32_1 = arith.constant 0 : i32
    %7 = vector.broadcast %c0_i32_1 : i32 to vector<1x256xi32>
    %8 = arith.cmpi slt, %4, %7 : vector<1x256xi32>
    %c0_i32_2 = arith.constant 0 : i32
    %9 = arith.cmpi slt, %2, %c0_i32_2 : i32
    %10 = vector.broadcast %9 : i1 to vector<1x256xi1>
    %11 = vector.broadcast %10 : vector<1x256xi1> to vector<1x256xi1>
    %12 = arith.xori %8, %11 : vector<1x256xi1>
    %13 = arith.andi %12, %6 : vector<1x256xi1>
    %14 = vector.broadcast %2 : i32 to vector<1x256xi32>
    %15 = arith.addi %4, %14 : vector<1x256xi32>
    %16 = arith.select %13, %15, %4 : vector<1x256xi1>, vector<1x256xi32>
    %c0_i32_3 = arith.constant 0 : i32
    %17 = vector.broadcast %c0_i32_3 : i32 to vector<1x256xi32>
    %18 = arith.cmpi ne, %16, %17 : vector<1x256xi32>
    %c15_i32 = arith.constant 15 : i32
    %19 = vector.broadcast %c15_i32 : i32 to vector<1x256xi32>
    %20 = arith.cmpi ne, %16, %19 : vector<1x256xi32>
    %c0 = arith.constant 0 : index
    %c0_4 = arith.constant 0 : index
    %c0_5 = arith.constant 0 : index
    %21 = vector.load %arg1[%c0, %c0_4, %c0_5] : memref<1x4x256xf32, #tpu.memory_space<vmem>>, vector<1x4x256xf32>
    %22 = vector.shape_cast %21 : vector<1x4x256xf32> to vector<4x256xf32>
    %cst = arith.constant 0.000000e+00 : f32
    %23 = vector.broadcast %cst : f32 to vector<4x17xf32>
    %24 = vector.extract_strided_slice %22 {offsets = [0, 0], sizes = [4, 239], strides = [1, 1]} : vector<4x256xf32> to vector<4x239xf32>
    %25 = tpu.concatenate %23, %24 in 1 : vector<4x17xf32>, vector<4x239xf32> -> vector<4x256xf32>
    %cst_6 = arith.constant 0.000000e+00 : f32
    %26 = vector.shape_cast %18 : vector<1x256xi1> to vector<1x256xi1>
    %27 = vector.broadcast %26 : vector<1x256xi1> to vector<4x256xi1>
    %28 = vector.broadcast %cst_6 : f32 to vector<4x256xf32>
    %29 = arith.select %27, %25, %28 : vector<4x256xi1>, vector<4x256xf32>
    %cst_7 = arith.constant 0.000000e+00 : f32
    %30 = vector.broadcast %cst_7 : f32 to vector<4x16xf32>
    %31 = vector.extract_strided_slice %22 {offsets = [0, 0], sizes = [4, 240], strides = [1, 1]} : vector<4x256xf32> to vector<4x240xf32>
    %32 = tpu.concatenate %30, %31 in 1 : vector<4x16xf32>, vector<4x240xf32> -> vector<4x256xf32>
    %cst_8 = arith.constant 0.000000e+00 : f32
    %33 = vector.broadcast %cst_8 : f32 to vector<4x15xf32>
    %34 = vector.extract_strided_slice %22 {offsets = [0, 0], sizes = [4, 241], strides = [1, 1]} : vector<4x256xf32> to vector<4x241xf32>
    %35 = tpu.concatenate %33, %34 in 1 : vector<4x15xf32>, vector<4x241xf32> -> vector<4x256xf32>
    %cst_9 = arith.constant 0.000000e+00 : f32
    %36 = vector.shape_cast %20 : vector<1x256xi1> to vector<1x256xi1>
    %37 = vector.broadcast %36 : vector<1x256xi1> to vector<4x256xi1>
    %38 = vector.broadcast %cst_9 : f32 to vector<4x256xf32>
    %39 = arith.select %37, %35, %38 : vector<4x256xi1>, vector<4x256xf32>
    %cst_10 = arith.constant 0.000000e+00 : f32
    %40 = vector.broadcast %cst_10 : f32 to vector<4x1xf32>
    %41 = vector.extract_strided_slice %22 {offsets = [0, 0], sizes = [4, 255], strides = [1, 1]} : vector<4x256xf32> to vector<4x255xf32>
    %42 = tpu.concatenate %40, %41 in 1 : vector<4x1xf32>, vector<4x255xf32> -> vector<4x256xf32>
    %cst_11 = arith.constant 0.000000e+00 : f32
    %43 = vector.shape_cast %18 : vector<1x256xi1> to vector<1x256xi1>
    %44 = vector.broadcast %43 : vector<1x256xi1> to vector<4x256xi1>
    %45 = vector.broadcast %cst_11 : f32 to vector<4x256xf32>
    %46 = arith.select %44, %42, %45 : vector<4x256xi1>, vector<4x256xf32>
    %47 = vector.extract_strided_slice %22 {offsets = [0, 1], sizes = [4, 255], strides = [1, 1]} : vector<4x256xf32> to vector<4x255xf32>
    %cst_12 = arith.constant 0.000000e+00 : f32
    %48 = vector.broadcast %cst_12 : f32 to vector<4x1xf32>
    %49 = tpu.concatenate %47, %48 in 1 : vector<4x255xf32>, vector<4x1xf32> -> vector<4x256xf32>
    %cst_13 = arith.constant 0.000000e+00 : f32
    %50 = vector.shape_cast %20 : vector<1x256xi1> to vector<1x256xi1>
    %51 = vector.broadcast %50 : vector<1x256xi1> to vector<4x256xi1>
    %52 = vector.broadcast %cst_13 : f32 to vector<4x256xf32>
    %53 = arith.select %51, %49, %52 : vector<4x256xi1>, vector<4x256xf32>
    %54 = vector.extract_strided_slice %22 {offsets = [0, 15], sizes = [4, 241], strides = [1, 1]} : vector<4x256xf32> to vector<4x241xf32>
    %cst_14 = arith.constant 0.000000e+00 : f32
    %55 = vector.broadcast %cst_14 : f32 to vector<4x15xf32>
    %56 = tpu.concatenate %54, %55 in 1 : vector<4x241xf32>, vector<4x15xf32> -> vector<4x256xf32>
    %cst_15 = arith.constant 0.000000e+00 : f32
    %57 = vector.shape_cast %18 : vector<1x256xi1> to vector<1x256xi1>
    %58 = vector.broadcast %57 : vector<1x256xi1> to vector<4x256xi1>
    %59 = vector.broadcast %cst_15 : f32 to vector<4x256xf32>
    %60 = arith.select %58, %56, %59 : vector<4x256xi1>, vector<4x256xf32>
    %61 = vector.extract_strided_slice %22 {offsets = [0, 16], sizes = [4, 240], strides = [1, 1]} : vector<4x256xf32> to vector<4x240xf32>
    %cst_16 = arith.constant 0.000000e+00 : f32
    %62 = vector.broadcast %cst_16 : f32 to vector<4x16xf32>
    %63 = tpu.concatenate %61, %62 in 1 : vector<4x240xf32>, vector<4x16xf32> -> vector<4x256xf32>
    %64 = vector.extract_strided_slice %22 {offsets = [0, 17], sizes = [4, 239], strides = [1, 1]} : vector<4x256xf32> to vector<4x239xf32>
    %cst_17 = arith.constant 0.000000e+00 : f32
    %65 = vector.broadcast %cst_17 : f32 to vector<4x17xf32>
    %66 = tpu.concatenate %64, %65 in 1 : vector<4x239xf32>, vector<4x17xf32> -> vector<4x256xf32>
    %cst_18 = arith.constant 0.000000e+00 : f32
    %67 = vector.shape_cast %20 : vector<1x256xi1> to vector<1x256xi1>
    %68 = vector.broadcast %67 : vector<1x256xi1> to vector<4x256xi1>
    %69 = vector.broadcast %cst_18 : f32 to vector<4x256xf32>
    %70 = arith.select %68, %66, %69 : vector<4x256xi1>, vector<4x256xf32>
    %71 = tpu.concatenate %29, %32, %39, %46, %22, %53, %60, %63, %70 in 0 : vector<4x256xf32>, vector<4x256xf32>, vector<4x256xf32>, vector<4x256xf32>, vector<4x256xf32>, vector<4x256xf32>, vector<4x256xf32>, vector<4x256xf32>, vector<4x256xf32> -> vector<36x256xf32>
    %c0_19 = arith.constant 0 : index
    %c0_20 = arith.constant 0 : index
    %72 = vector.load %arg2[%c0_19, %c0_20] : memref<64x36xf32, #tpu.memory_space<vmem>>, vector<64x36xf32>
    %cst_21 = arith.constant dense<0.000000e+00> : vector<64x256xf32>
    %73 = tpu.matmul %72, %71, %cst_21 {dimension_numbers = #tpu.dot_dimension_numbers<[1], [0], [0], [1], [0, 0, 1, 1], [], []>} : vector<64x36xf32>, vector<36x256xf32>, vector<64x256xf32> -> vector<64x256xf32>
    %c0_22 = arith.constant 0 : index
    %c0_23 = arith.constant 0 : index
    %74 = vector.load %arg3[%c0_22, %c0_23] : memref<64x1xf32, #tpu.memory_space<vmem>>, vector<64x1xf32>
    %75 = vector.broadcast %74 : vector<64x1xf32> to vector<64x256xf32>
    %76 = arith.addf %73, %75 : vector<64x256xf32>
    %cst_24 = arith.constant 0.000000e+00 : f32
    %77 = vector.broadcast %cst_24 : f32 to vector<64x17xf32>
    %78 = vector.extract_strided_slice %76 {offsets = [0, 0], sizes = [64, 239], strides = [1, 1]} : vector<64x256xf32> to vector<64x239xf32>
    %79 = tpu.concatenate %77, %78 in 1 : vector<64x17xf32>, vector<64x239xf32> -> vector<64x256xf32>
    %cst_25 = arith.constant 0.000000e+00 : f32
    %80 = vector.shape_cast %18 : vector<1x256xi1> to vector<1x256xi1>
    %81 = vector.broadcast %80 : vector<1x256xi1> to vector<64x256xi1>
    %82 = vector.broadcast %cst_25 : f32 to vector<64x256xf32>
    %83 = arith.select %81, %79, %82 : vector<64x256xi1>, vector<64x256xf32>
    %cst_26 = arith.constant 0.000000e+00 : f32
    %84 = vector.broadcast %cst_26 : f32 to vector<64x16xf32>
    %85 = vector.extract_strided_slice %76 {offsets = [0, 0], sizes = [64, 240], strides = [1, 1]} : vector<64x256xf32> to vector<64x240xf32>
    %86 = tpu.concatenate %84, %85 in 1 : vector<64x16xf32>, vector<64x240xf32> -> vector<64x256xf32>
    %cst_27 = arith.constant 0.000000e+00 : f32
    %87 = vector.broadcast %cst_27 : f32 to vector<64x15xf32>
    %88 = vector.extract_strided_slice %76 {offsets = [0, 0], sizes = [64, 241], strides = [1, 1]} : vector<64x256xf32> to vector<64x241xf32>
    %89 = tpu.concatenate %87, %88 in 1 : vector<64x15xf32>, vector<64x241xf32> -> vector<64x256xf32>
    %cst_28 = arith.constant 0.000000e+00 : f32
    %90 = vector.shape_cast %20 : vector<1x256xi1> to vector<1x256xi1>
    %91 = vector.broadcast %90 : vector<1x256xi1> to vector<64x256xi1>
    %92 = vector.broadcast %cst_28 : f32 to vector<64x256xf32>
    %93 = arith.select %91, %89, %92 : vector<64x256xi1>, vector<64x256xf32>
    %cst_29 = arith.constant 0.000000e+00 : f32
    %94 = vector.broadcast %cst_29 : f32 to vector<64x1xf32>
    %95 = vector.extract_strided_slice %76 {offsets = [0, 0], sizes = [64, 255], strides = [1, 1]} : vector<64x256xf32> to vector<64x255xf32>
    %96 = tpu.concatenate %94, %95 in 1 : vector<64x1xf32>, vector<64x255xf32> -> vector<64x256xf32>
    %cst_30 = arith.constant 0.000000e+00 : f32
    %97 = vector.shape_cast %18 : vector<1x256xi1> to vector<1x256xi1>
    %98 = vector.broadcast %97 : vector<1x256xi1> to vector<64x256xi1>
    %99 = vector.broadcast %cst_30 : f32 to vector<64x256xf32>
    %100 = arith.select %98, %96, %99 : vector<64x256xi1>, vector<64x256xf32>
    %101 = vector.extract_strided_slice %76 {offsets = [0, 1], sizes = [64, 255], strides = [1, 1]} : vector<64x256xf32> to vector<64x255xf32>
    %cst_31 = arith.constant 0.000000e+00 : f32
    %102 = vector.broadcast %cst_31 : f32 to vector<64x1xf32>
    %103 = tpu.concatenate %101, %102 in 1 : vector<64x255xf32>, vector<64x1xf32> -> vector<64x256xf32>
    %cst_32 = arith.constant 0.000000e+00 : f32
    %104 = vector.shape_cast %20 : vector<1x256xi1> to vector<1x256xi1>
    %105 = vector.broadcast %104 : vector<1x256xi1> to vector<64x256xi1>
    %106 = vector.broadcast %cst_32 : f32 to vector<64x256xf32>
    %107 = arith.select %105, %103, %106 : vector<64x256xi1>, vector<64x256xf32>
    %108 = vector.extract_strided_slice %76 {offsets = [0, 15], sizes = [64, 241], strides = [1, 1]} : vector<64x256xf32> to vector<64x241xf32>
    %cst_33 = arith.constant 0.000000e+00 : f32
    %109 = vector.broadcast %cst_33 : f32 to vector<64x15xf32>
    %110 = tpu.concatenate %108, %109 in 1 : vector<64x241xf32>, vector<64x15xf32> -> vector<64x256xf32>
    %cst_34 = arith.constant 0.000000e+00 : f32
    %111 = vector.shape_cast %18 : vector<1x256xi1> to vector<1x256xi1>
    %112 = vector.broadcast %111 : vector<1x256xi1> to vector<64x256xi1>
    %113 = vector.broadcast %cst_34 : f32 to vector<64x256xf32>
    %114 = arith.select %112, %110, %113 : vector<64x256xi1>, vector<64x256xf32>
    %115 = vector.extract_strided_slice %76 {offsets = [0, 16], sizes = [64, 240], strides = [1, 1]} : vector<64x256xf32> to vector<64x240xf32>
    %cst_35 = arith.constant 0.000000e+00 : f32
    %116 = vector.broadcast %cst_35 : f32 to vector<64x16xf32>
    %117 = tpu.concatenate %115, %116 in 1 : vector<64x240xf32>, vector<64x16xf32> -> vector<64x256xf32>
    %118 = vector.extract_strided_slice %76 {offsets = [0, 17], sizes = [64, 239], strides = [1, 1]} : vector<64x256xf32> to vector<64x239xf32>
    %cst_36 = arith.constant 0.000000e+00 : f32
    %119 = vector.broadcast %cst_36 : f32 to vector<64x17xf32>
    %120 = tpu.concatenate %118, %119 in 1 : vector<64x239xf32>, vector<64x17xf32> -> vector<64x256xf32>
    %cst_37 = arith.constant 0.000000e+00 : f32
    %121 = vector.shape_cast %20 : vector<1x256xi1> to vector<1x256xi1>
    %122 = vector.broadcast %121 : vector<1x256xi1> to vector<64x256xi1>
    %123 = vector.broadcast %cst_37 : f32 to vector<64x256xf32>
    %124 = arith.select %122, %120, %123 : vector<64x256xi1>, vector<64x256xf32>
    %125 = tpu.concatenate %83, %86, %93, %100, %76, %107, %114, %117, %124 in 0 : vector<64x256xf32>, vector<64x256xf32>, vector<64x256xf32>, vector<64x256xf32>, vector<64x256xf32>, vector<64x256xf32>, vector<64x256xf32>, vector<64x256xf32>, vector<64x256xf32> -> vector<576x256xf32>
    %c0_38 = arith.constant 0 : index
    %c0_39 = arith.constant 0 : index
    %126 = vector.load %arg4[%c0_38, %c0_39] : memref<8x576xf32, #tpu.memory_space<vmem>>, vector<8x576xf32>
    %cst_40 = arith.constant dense<0.000000e+00> : vector<8x256xf32>
    %127 = tpu.matmul %126, %125, %cst_40 {dimension_numbers = #tpu.dot_dimension_numbers<[1], [0], [0], [1], [0, 0, 1, 1], [], []>} : vector<8x576xf32>, vector<576x256xf32>, vector<8x256xf32> -> vector<8x256xf32>
    %c0_41 = arith.constant 0 : index
    %c0_42 = arith.constant 0 : index
    %128 = vector.load %arg5[%c0_41, %c0_42] : memref<8x1xf32, #tpu.memory_space<vmem>>, vector<8x1xf32>
    %129 = vector.broadcast %128 : vector<8x1xf32> to vector<8x256xf32>
    %130 = arith.addf %127, %129 : vector<8x256xf32>
    %c0_43 = arith.constant 0 : index
    %c0_44 = arith.constant 0 : index
    %c0_45 = arith.constant 0 : index
    %131 = vector.load %arg6[%c0_43, %c0_44, %c0_45] : memref<1x8x256xf32, #tpu.memory_space<vmem>>, vector<1x8x256xf32>
    %132 = vector.shape_cast %131 : vector<1x8x256xf32> to vector<8x256xf32>
    %133 = vector.shape_cast %130 : vector<8x256xf32> to vector<1x8x256xf32>
    tpu.vector_store %arg6[%c0_43, %c0_44, %c0_45], %133 {strides = array<i32>} : memref<1x8x256xf32, #tpu.memory_space<vmem>>, vector<1x8x256xf32>,
    return
  }
  func.func @transform_0(%arg0: i32) -> (i32, i32, i32) {
    %c0_i32 = arith.constant 0 : i32
    %c0_i32_0 = arith.constant 0 : i32
    %c0_i32_1 = arith.constant 0 : i32
    return %arg0, %c0_i32, %c0_i32_0 : i32, i32, i32
  }
  func.func @transform_1(%arg0: i32) -> (i32, i32) {
    %c0_i32 = arith.constant 0 : i32
    %c0_i32_0 = arith.constant 0 : i32
    %c0_i32_1 = arith.constant 0 : i32
    return %c0_i32, %c0_i32_0 : i32, i32
  }
  func.func @transform_2(%arg0: i32) -> (i32, i32) {
    %c0_i32 = arith.constant 0 : i32
    %c0_i32_0 = arith.constant 0 : i32
    %c0_i32_1 = arith.constant 0 : i32
    return %c0_i32, %c0_i32_0 : i32, i32
  }
  func.func @transform_3(%arg0: i32) -> (i32, i32) {
    %c0_i32 = arith.constant 0 : i32
    %c0_i32_0 = arith.constant 0 : i32
    %c0_i32_1 = arith.constant 0 : i32
    return %c0_i32, %c0_i32_0 : i32, i32
  }
  func.func @transform_4(%arg0: i32) -> (i32, i32) {
    %c0_i32 = arith.constant 0 : i32
    %c0_i32_0 = arith.constant 0 : i32
    %c0_i32_1 = arith.constant 0 : i32
    return %c0_i32, %c0_i32_0 : i32, i32
  }
  func.func @transform_5(%arg0: i32) -> (i32, i32, i32) {
    %c0_i32 = arith.constant 0 : i32
    %c0_i32_0 = arith.constant 0 : i32
    %c0_i32_1 = arith.constant 0 : i32
    return %arg0, %c0_i32, %c0_i32_0 : i32, i32, i32
  }
}

</mosaic_0001>

<bundles_post_ra>
// kernel: tpu_custom_call.1
= control target key start
LH: loop header
LB: loop body
LE: loop exit
PB: predicated region body
PF: predicated region fallthrough
CT: control target
= control target key end

     0   :  { %10 = vsyncpa [#allocation3], 0  ;;  %s3232_s0 = inlined_call_operand.vmem [shape: f32[2,4,256], index: 0, kind: input, shape index: {}]   ;;  %s3233_s1 = inlined_call_operand.vmem [shape: f32[64,36], index: 1, kind: input, shape index: {}]   ;;  %s3234_s2 = inlined_call_operand.vmem [shape: f32[64,1], index: 2, kind: input, shape index: {}]   ;;  %s3235_s3 = inlined_call_operand.vmem [shape: f32[8,576], index: 3, kind: input, shape index: {}]   ;;  %s3236_s4 = inlined_call_operand.vmem [shape: f32[8,1], index: 4, kind: input, shape index: {}]   ;;  %s3237_s5 = inlined_call_operand.hbm [shape: f32[2,8,256], index: 5, kind: output, shape index: {}]  }
   0x1   :  { %12 = vsyncpa [#allocation3 + $0x1], 0  ;;  %s2378_s18 = smov 0   ;;  %s2380_s19 = smov 0  }
   0x2   :  { %s2382_s20 = smov 0   ;;  %s2384_s21 = smov 0  }
   0x3 LB: > { %s2399_s22 = sadd.s32 4294967295, %s2335_s21   ;;  %s1507_s23 = sadd.s32 4294967294, %s2335_s21   ;;  %s2335_s21 = sphi %s2384_s21, %s3271_s21   ;;  %s2331_s20 = sphi %s2382_s20, %s3270_s20   ;;  %s2327_s19 = sphi %s2380_s19, %s3269_s19   ;;  %s2323_s18 = sphi %s2378_s18, %s3268_s18  }
   0x4   : > { %s2403_s24 = sadd.s32 1, %s2335_s21   ;;  %s135_s25 = sadd.s32 1, %s2331_s20 }
   0x5   : > { %s132_s26 = ssub.s32 %s2335_s21, %s2403_s24  ;;  %p145_p0 = scmp.ne.s32.totalorder %s2331_s20, %s2327_s19 }
   0x6   : > { %p133_p1 = scmp.eq.s32.totalorder %s132_s26, 0  ;;  %p146_p2 = scmp.eq.s32.totalorder %s2399_s22, 1 }
   0x7   : > { %p151_p3 = scmp.ne.s32.totalorder %s2327_s19, %s2323_s18  ;;  %p152_p4 = scmp.eq.s32.totalorder %s1507_s23, 1 }
   0x8   : > { %s2414_s27 = scalar_select %p133_p1, %s2331_s20, %s135_s25  }
   0x9   : > { %p2416_p5 = por %p146_p2, %p145_p0  ;;  %p2420_p6 = por %p152_p4, %p151_p3 }
   0xa   : > { %p1510_p7 = scmp.ge.s32.totalorder %s2335_s21, 1  ;;  %p190_p8 = scmp.lt.s32.totalorder %s2335_s21, 3 }
   0xc   : > { %p191_p9 = pnand %p1510_p7, %p190_p8 }
   0xd   : > { %p218_p10 = scmp.lt.s32.totalorder (!%p191_p9), %s2399_s22, 1  ;;  %s2337_s10 = smov (!%p191_p9), 17   ;;  %v2345_v4 = vmov (!%p191_p9), 0.0   ;;  %v387_v5 = vld [vmem:[%s3234_s2] sm:$0xff] (!%p191_p9)  ;;  %v2346_v6 = vmov (!%p191_p9), 0   ;;  %v388_v7 = vld [vmem:[%s3234_s2 + $0x8] sm:$0xff] (!%p191_p9)  ;;  %v223_v14 = vlaneseq (!%p191_p9) }
   0xe   : > { %194 = sbr.rel (%p191_p9) target bundleno = 866 (0x362), region = 40  ;;  %s3240_s11 = smov (!%p191_p9), 1   ;;  %530 = vmatprep.mubr.f32.mxu0 (!%p191_p9), %v2345_v4  ;;  %1950 = vset.pattern.permute.xlu1 (!%p191_p9), %v2346_v6  ;;  %v389_v8 = vld [vmem:[%s3234_s2 + $0x10] sm:$0xff] (!%p191_p9)  ;;  %v391_v9 = vld [vmem:[%s3234_s2 + $0x20] sm:$0xff] (!%p191_p9)  ;;  %v390_v10 = vld [vmem:[%s3234_s2 + $0x18] sm:$0xff] (!%p191_p9)  ;;  %vm261_vm0 = vcmask (!%p191_p9), 138240  }
   0xf   : > { %s2339_s12 = smov (!%p191_p9), 15   ;;  %s2340_s13 = smov (!%p191_p9), 16   ;;  %1951 = vset.pattern.permute.xlu0 (!%p191_p9), %v2346_v6  ;;  %v393_v11 = vld [vmem:[%s3234_s2 + $0x30] sm:$0xff] (!%p191_p9)  ;;  %v392_v12 = vld [vmem:[%s3234_s2 + $0x28] sm:$0xff] (!%p191_p9)  ;;  %v394_v13 = vld [vmem:[%s3234_s2 + $0x38] sm:$0xff] (!%p191_p9)  ;;  %v224_v15 = vand.u32 (!%p191_p9), 127, %v223_v14 }
  0x10   : > { %s2341_s14 = smov (!%p191_p9), 127   ;;  %s2342_s15 = smov (!%p191_p9), 112   ;;  %vm299_vm2 = vcmask (!%p191_p9), 7168   ;;  %vm284_vm4 = vcmask (!%p191_p9), 121856   ;;  %vm276_vm5 = vcmask (!%p191_p9), 130048   ;;  %vm310_vm7 = vcmask (!%p191_p9), 1039360  }
  0x11   : > { %s2343_s16 = smov (!%p191_p9), 113   ;;  %s3238_s17 = smov (!%p191_p9), 111   ;;  %v225_v16 = vadd.s32 (!%p191_p9), 128, %v224_v15  ;;  %v230_v17 = vand.u32 (!%p191_p9), 15, %v224_v15  ;;  %vm370_vm8 = vcmask (!%p191_p9), 1043456   ;;  %vm332_vm10 = vcmask (!%p191_p9), 916480  }
  0x12   : > { %vm321_vm11 = vcmask (!%p191_p9), 924672   ;;  %vm340_vm12 = vcmask (!%p191_p9), 908288   ;;  %vm435_vm13 = vcmask (!%p191_p9), 293888   ;;  %s215_s23 = sand.u32 (!%p191_p9), 1, %s2327_s19  }
  0x13   : > { %v237_v18 = vand.u32 (!%p191_p9), 15, %v225_v16  ;;  %vm2477_vm1 = vcmp.ne.s32.totalorder (!%p191_p9), %v230_v17, 0  ;;  %vm2485_vm6 = vcmp.ne.s32.totalorder (!%p191_p9), %v230_v17, 15  ;;  %s1511_s25 = sshll.u32 (!%p191_p9), %s215_s23, 4 }
  0x14   : > { %vm2759_vm15 = vmpackc.low (!%p191_p9), %vm2477_vm1, %vm2477_vm1 }
  0x15   : > { %s219_s30 = scalar_select %p218_p10, %s2399_s22, 1  ;;  %vm2481_vm3 = vcmp.ne.s32.totalorder %v237_v18, 0  ;;  %vm2494_vm9 = vcmp.ne.s32.totalorder %v237_v18, 15 }
  0x16   : > { %vm2748_vm14 = vmpackc.low %vm2481_vm3, %vm2481_vm3 }
  0x17   : > { %s1650_s6 = sshll.u32 %s219_s30, 3  ;;  %s2347_s30 = smov [#allocation2]  }
  0x18   : > { %s222_s9 = scalar_lea.vmem %s3232_s0, %s1650_s6  ;;  %s2277_s6 = sshll.u32 %s2347_s30, 4  ;;  %s2278_s6 = int_to_ptr.vmem [resolvable:$false] %s2277_s6 }
  0x19   : > { %v2431_v0 = vld [vmem:[%s222_s9] sm:$0xff]  ;;  %s2279_s7 = scalar_lea.vmem %s2278_s6, 512 }
  0x1a   : > { %v2435_v1 = vcombine.high %v2431_v0, %v2431_v0 }
  0x1c   : > { %v1925_v2 = vpack.i.bf16 %v2435_v1, %v2431_v0  ;;  %v1935_v3 = vpack.i.bf16 %v2431_v0, %v2435_v1 }
  0x1e   : > { %1926 = vrot.lane.b32.xlu1 %v1925_v2, %s2337_s10  ;;  %1916 = vrot.lane.b32.xlu0 %v1925_v2, %s3240_s11 }
  0x22   : > { %1931 = vrot.lane.b32.xlu1 %v1925_v2, %s2339_s12  ;;  %1921 = vrot.lane.b32.xlu0 %v1925_v2, %s2340_s13 }
  0x26   : > { %1936 = vrot.lane.b32.xlu0 %v1935_v3, %s2341_s14  ;;  %1941 = vrot.lane.b32.xlu1 %v1935_v3, %s2342_s15 }
  0x2a   : > { %1946 = vrot.lane.b32.xlu0 %v1935_v3, %s2343_s16  ;;  %338 = vrot.lane.b32.xlu1 %v2435_v1, %s3238_s17 }
  0x2e   : > { %336 = vrot.lane.b32.xlu0 %v2431_v0, %s3238_s17  ;;  %397 = vperm.xlu1 %1950, %v387_v5  }
  0x32   : > { %402 = vperm.xlu0 %1951, %v388_v7   ;;  %407 = vperm.xlu1 %1950, %v389_v8  }
  0x36   : > { %417 = vperm.xlu0 %1951, %v391_v9   ;;  %412 = vperm.xlu1 %1950, %v390_v10  }
  0x3a   : > { %427 = vperm.xlu0 %1951, %v393_v11   ;;  %422 = vperm.xlu1 %1950, %v392_v12  }
  0x3e   : > { %432 = vperm.xlu1 %1950, %v394_v13  }
  0x90   : > { %v1927_v19 = vpop.permute.xlu1 %1926  ;;  %v1917_v21 = vpop.permute.xlu0 %1916 }
  0x91   : > { %v1929_v23 = vunpack.i.h.bf16 %v1927_v19  ;;  %v1928_v24 = vunpack.i.l.bf16 %v1927_v19  ;;  %v1919_v25 = vunpack.i.h.bf16 %v1917_v21  ;;  %v1918_v26 = vunpack.i.l.bf16 %v1917_v21 }
  0x93   : > { %v300_v28 = vsel %vm299_vm2, %v1918_v26, %v1919_v25  ;;  %v303_v29 = vsel %vm299_vm2, 0.0, %v1918_v26  ;;  %v262_v30 = vsel %vm261_vm0, %v1928_v24, %v1929_v23  ;;  %v265_v39 = vsel %vm261_vm0, 0.0, %v1928_v24 }
  0x94   : > { %v304_v31 = vsel %vm2477_vm1, %v303_v29, 0.0  ;;  %v1932_v32 = vpop.permute.xlu1 %1931  ;;  %v1922_v33 = vpop.permute.xlu0 %1921  ;;  %v305_v35 = vsel %vm2481_vm3, %v300_v28, 0.0  ;;  %v271_v41 = vsel %vm2481_vm3, %v262_v30, 0.0  ;;  %v270_v59 = vsel %vm2477_vm1, %v265_v39, 0.0  ;;  %v383_v39 = vld [vmem:[%s3233_s1 + $0x20] sm:$0xff] }
  0x95   : > { %v1934_v36 = vunpack.i.h.bf16 %v1932_v32  ;;  %v1933_v37 = vunpack.i.l.bf16 %v1932_v32  ;;  %v1924_v38 = vunpack.i.h.bf16 %v1922_v33  ;;  %v1923_v40 = vunpack.i.l.bf16 %v1922_v33 }
  0x96   : > { %v354_v42 = vrot.slane %v304_v31, 4  ;;  %v355_v45 = vrot.slane %v305_v35, 4 }
  0x97   : > { %v288_v43 = vsel %vm284_vm4, 0.0, %v1933_v37  ;;  %v285_v44 = vsel %vm284_vm4, %v1933_v37, %v1934_v36  ;;  %v279_v46 = vsel %vm276_vm5, 0.0, %v1923_v40  ;;  %v277_v49 = vsel %vm276_vm5, %v1923_v40, %v1924_v38  ;;  %v381_v37 = vld [vmem:[%s3233_s1 + $0x10] sm:$0xff]  ;;  %v382_v38 = vld [vmem:[%s3233_s1 + $0x18] sm:$0xff]  ;;  %v384_v40 = vld [vmem:[%s3233_s1 + $0x28] sm:$0xff] }
  0x98   : > { %v1937_v47 = vpop.permute.xlu0 %1936  ;;  %v1942_v48 = vpop.permute.xlu1 %1941  ;;  %v294_v50 = vsel %vm2494_vm9, %v285_v44, 0.0  ;;  %v293_v51 = vsel %vm2485_vm6, %v288_v43, 0.0  ;;  %v348_v52 = vrot.slane %v279_v46, 4  ;;  %v349_v57 = vrot.slane %v277_v49, 4 }
  0x99   : > { %v1939_v53 = vunpack.i.h.bf16 %v1937_v47  ;;  %v1938_v54 = vunpack.i.l.bf16 %v1937_v47  ;;  %v1944_v55 = vunpack.i.h.bf16 %v1942_v48  ;;  %v1943_v56 = vunpack.i.l.bf16 %v1942_v48 }
  0x9a   : > { %v374_v58 = vsel %vm370_vm8, %v294_v50, %v355_v45  ;;  %v371_v62 = vsel %vm370_vm8, %v270_v59, %v348_v52  ;;  %v373_v63 = vsel %vm370_vm8, %v293_v51, %v354_v42  ;;  %v372_v14 = vsel %vm370_vm8, %v271_v41, %v349_v57  ;;  %v385_v41 = vld [vmem:[%s3233_s1 + $0x30] sm:$0xff]  ;;  %v386_v42 = vld [vmem:[%s3233_s1 + $0x38] sm:$0xff] }
  0x9b   : > { %v311_v60 = vsel %vm310_vm7, %v1939_v53, %v1938_v54  ;;  %v314_v61 = vsel %vm310_vm7, %v1938_v54, 0.0  ;;  %v333_v5 = vsel %vm332_vm10, %v1944_v55, %v1943_v56  ;;  %v335_v6 = vsel %vm332_vm10, %v1943_v56, 0.0 }
  0x9c   : > { %v315_v2 = vsel %vm2485_vm6, %v311_v60, 0.0  ;;  %v316_v3 = vsel %vm2494_vm9, %v314_v61, 0.0  ;;  %v1947_v7 = vpop.permute.xlu0 %1946  ;;  %v366_v10 = vrot.slane %v333_v5, 4  ;;  %v367_v11 = vrot.slane %v335_v6, 4  ;;  %v339_v16 = vpop.permute.xlu1 %338 }
  0x9d   : > { %v361_v8 = vrot.slane %v315_v2, 4  ;;  %v362_v9 = vrot.slane %v316_v3, 4  ;;  %v1949_v12 = vunpack.i.h.bf16 %v1947_v7  ;;  %v1948_v13 = vunpack.i.l.bf16 %v1947_v7 }
  0x9e   : > { %v1654_v15 = vpack.c.bf16 %v373_v63, %v371_v62  ;;  %v1652_v17 = vpack.c.bf16 %v374_v58, %v372_v14  ;;  %v344_v23 = vsel %vm340_vm12, %v339_v16, 0.0 }
  0x9f   : > { %v322_v18 = vsel %vm321_vm11, %v1949_v12, %v1948_v13  ;;  %v325_v19 = vsel %vm321_vm11, %v1948_v13, 0.0  ;;  %v376_v26 = vsel %vm370_vm8, %v2435_v1, %v362_v9  ;;  %v375_v29 = vsel %vm370_vm8, %v2431_v0, %v361_v8  ;;  %v379_v0 = vld [vmem:[%s3233_s1] sm:$0xff]  ;;  %v380_v1 = vld [vmem:[%s3233_s1 + $0x8] sm:$0xff] }
  0xa0   : > { %v327_v21 = vsel %vm2481_vm3, %v325_v19, 0.0  ;;  %1653 = vmatprep.subr.bf16.mxu0 %v1652_v17  ;;  %v337_v24 = vpop.permute.xlu0 %336  ;;  %v326_v25 = vsel %vm2477_vm1, %v322_v18, 0.0  ;;  %v346_v33 = vsel %vm2494_vm9, %v344_v23, 0.0  ;;  %vm2772_vm1 = vmpackc.low %vm2494_vm9, %vm2494_vm9 }
  0xa1   : > { %1655 = vmatpush1.bf16.msra.mxu0 %v1654_v15  ;;  %v378_v28 = vsel %vm370_vm8, %v327_v21, %v367_v11  ;;  %v377_v30 = vsel %vm370_vm8, %v326_v25, %v366_v10  ;;  %v341_v35 = vsel %vm340_vm12, %v337_v24, %v339_v16  ;;  %vm2783_vm3 = vmpackc.low %vm2485_vm6, %vm2485_vm6 }
  0xa2   : > { %v1656_v31 = vpack.c.bf16 %v378_v28, %v376_v26  ;;  %v1658_v32 = vpack.c.bf16 %v377_v30, %v375_v29  ;;  %v345_v36 = vsel %vm2485_vm6, %v341_v35, 0.0 }
  0xa4   : > { %1657 = vmatprep.subr.bf16.mxu0 %v1656_v31 }
  0xa5   : > { %1659 = vmatpush1.bf16.msra.mxu0 %v1658_v32 }
  0xa6   : > { %1514 = vmatprep.subr.msk.mxu0 %vm370_vm8, %v346_v33 }
  0xa9   : > { %1515 = vmatpush1.msk.msra.mxu0 %vm370_vm8, %v345_v36 }
  0xaa   : > { %1516 = vmatmul.mubr.msk.f32.vlgmr.msra.gmra.mrb[0].mxu0 %vm435_vm13, %v379_v0 }
  0xab   : > { %536 = vmatprep.mubr.f32.mxu0 %v2345_v4 }
  0xad   : > { %v398_v43 = vpop.permute.xlu1 %397 }
  0xae   : > { %1517 = vmatmul.mubr.msk.f32.gmra.mrb[2].mxu0 %vm435_vm13, %v380_v1 }
  0xaf   : > { %542 = vmatprep.mubr.f32.mxu0 %v2345_v4 }
  0xb1   : > { %v403_v48 = vpop.permute.xlu0 %402  ;;  %v408_v53 = vpop.permute.xlu1 %407 }
  0xb2   : > { %1518 = vmatmul.mubr.msk.f32.gmra.mrb[4].mxu0 %vm435_vm13, %v381_v37 }
  0xb3   : > { %548 = vmatprep.mubr.f32.mxu0 %v2345_v4 }
  0xb5   : > { %v413_v2 = vpop.permute.xlu1 %412  ;;  %v418_v11 = vpop.permute.xlu0 %417 }
  0xb6   : > { %1519 = vmatmul.mubr.msk.f32.gmra.mrb[6].mxu0 %vm435_vm13, %v382_v38 }
  0xb7   : > { %554 = vmatprep.mubr.f32.mxu0 %v2345_v4 }
  0xb9   : > { %v423_v19 = vpop.permute.xlu1 %422  ;;  %v428_v30 = vpop.permute.xlu0 %427 }
  0xba   : > { %1520 = vmatmul.mubr.msk.f32.gmra.mrb[8].mxu0 %vm435_vm13, %v383_v39 }
  0xbb   : > { %560 = vmatprep.mubr.f32.mxu0 %v2345_v4 }
  0xbd   : > { %v433_v37 = vpop.permute.xlu1 %432 }
  0xbe   : > { %1521 = vmatmul.mubr.msk.f32.gmra.mrb[10].mxu0 %vm435_vm13, %v384_v40 }
  0xbf   : > { %566 = vmatprep.mubr.f32.mxu0 %v2345_v4 }
  0xc2   : > { %1522 = vmatmul.mubr.msk.f32.gmra.mrb[12].mxu0 %vm435_vm13, %v385_v41 }
  0xc3   : > { %572 = vmatprep.mubr.f32.mxu0 %v2345_v4 }
  0xc6   : > { %1523 = vmatmul.mubr.msk.f32.gmra.mrb[14].mxu0 %vm435_vm13, %v386_v42 }
 0x17d   : > { %v532_v44 = vpop.f32.mrb[0].mxu0 }
 0x17e   : > { %v533_v45 = vadd.f32 %v532_v44, %v398_v43  ;;  %v534_v46 = vpop.f32.mrb[1].mxu0 }
 0x17f   : > { %v535_v47 = vadd.f32 %v534_v46, %v398_v43 }
 0x181   : > { %v538_v49 = vpop.f32.mrb[2].mxu0  ;;  %v2584_v50 = vpack.i.bf16 %v535_v47, %v533_v45 }
 0x182   : > { %v539_v51 = vadd.f32 %v538_v49, %v403_v48  ;;  %v540_v52 = vpop.f32.mrb[3].mxu0 }
 0x183   : > { %v541_v54 = vadd.f32 %v540_v52, %v403_v48  ;;  %1953 = vrot.lane.b32.xlu0 %v2584_v50, %s2337_s10  ;;  %v1206_v48 = vld [vmem:[%s3235_s3 + $0x18] sm:$0xff] }
 0x184   : > { %v2588_v55 = vpack.i.bf16 %v539_v51, %v533_v45  ;;  %v1754_v56 = vpack.c.bf16 %v539_v51, %v533_v45  ;;  %1353 = vmatprep.mubr.f32.mxu1 %v1206_v48 }
 0x185   : > { %v544_v57 = vpop.f32.mrb[4].mxu0  ;;  %v1752_v58 = vpack.c.bf16 %v541_v54, %v535_v47  ;;  %v2590_v59 = vpack.i.bf16 %v541_v54, %v539_v51  ;;  %v2592_v60 = vpack.i.bf16 %v541_v54, %v535_v47  ;;  %v1204_v51 = vld [vmem:[%s3235_s3 + $0x8] sm:$0xff] }
 0x186   : > { %v545_v61 = vadd.f32 %v544_v57, %v408_v53  ;;  %v546_v62 = vpop.f32.mrb[5].mxu0  ;;  %1973 = vrot.lane.b32.xlu1 %v2588_v55, %s2341_s14  ;;  %1282 = vmatprep.mubr.f32.mxu0 %v1204_v51 }
 0x187   : > { %v547_v63 = vadd.f32 %v546_v62, %v408_v53  ;;  %1753 = vmatprep.subr.bf16.mxu1 %v1752_v58  ;;  %1958 = vrot.lane.b32.xlu0 %v2584_v50, %s2340_s13  ;;  %v1208_v58 = vld [vmem:[%s3236_s4] sm:$0xff] }
 0x188   : > { %1755 = vmatpush1.bf16.msra.mxu1 %v1754_v56 }
 0x189   : > { %v550_v3 = vpop.f32.mrb[6].mxu0  ;;  %v2598_v5 = vpack.i.bf16 %v547_v63, %v545_v61 }
 0x18a   : > { %v551_v6 = vadd.f32 %v550_v3, %v413_v2  ;;  %v552_v7 = vpop.f32.mrb[7].mxu0  ;;  %1978 = vrot.lane.b32.xlu1 %v2588_v55, %s2343_s16 }
 0x18b   : > { %v553_v8 = vadd.f32 %v552_v7, %v413_v2  ;;  %1963 = vrot.lane.b32.xlu0 %v2584_v50, %s2339_s12 }
 0x18c   : > { %v1758_v9 = vpack.c.bf16 %v551_v6, %v545_v61  ;;  %v2604_v10 = vpack.i.bf16 %v551_v6, %v545_v61 }
 0x18d   : > { %v556_v12 = vpop.f32.mrb[8].mxu0  ;;  %v1756_v13 = vpack.c.bf16 %v553_v8, %v547_v63  ;;  %v2606_v14 = vpack.i.bf16 %v553_v8, %v551_v6  ;;  %v2608_v15 = vpack.i.bf16 %v553_v8, %v547_v63 }
 0x18e   : > { %v557_v16 = vadd.f32 %v556_v12, %v418_v11  ;;  %v558_v17 = vpop.f32.mrb[9].mxu0  ;;  %1983 = vrot.lane.b32.xlu1 %v2590_v59, %s2337_s10 }
 0x18f   : > { %v559_v18 = vadd.f32 %v558_v17, %v418_v11  ;;  %1968 = vrot.lane.b32.xlu0 %v2584_v50, %s2342_s15  ;;  %1757 = vmatprep.subr.bf16.mxu1 %v1756_v13 }
 0x190   : > { %1759 = vmatpush1.bf16.msra.mxu1 %v1758_v9 }
 0x191   : > { %v562_v21 = vpop.f32.mrb[10].mxu0  ;;  %v2614_v23 = vpack.i.bf16 %v559_v18, %v557_v16 }
 0x192   : > { %v563_v24 = vadd.f32 %v562_v21, %v423_v19  ;;  %v564_v25 = vpop.f32.mrb[11].mxu0  ;;  %1993 = vrot.lane.b32.xlu1 %v2590_v59, %s2340_s13 }
 0x193   : > { %v565_v26 = vadd.f32 %v564_v25, %v423_v19  ;;  %1988 = vrot.lane.b32.xlu0 %v2592_v60, %s2341_s14 }
 0x194   : > { %v1762_v28 = vpack.c.bf16 %v563_v24, %v557_v16  ;;  %v2620_v29 = vpack.i.bf16 %v563_v24, %v557_v16 }
 0x195   : > { %v568_v31 = vpop.f32.mrb[12].mxu0  ;;  %v1760_v32 = vpack.c.bf16 %v565_v26, %v559_v18  ;;  %v2622_v33 = vpack.i.bf16 %v565_v26, %v563_v24  ;;  %v2624_v35 = vpack.i.bf16 %v565_v26, %v559_v18 }
 0x196   : > { %v569_v36 = vadd.f32 %v568_v31, %v428_v30  ;;  %v570_v0 = vpop.f32.mrb[13].mxu0  ;;  %2003 = vrot.lane.b32.xlu1 %v2590_v59, %s2339_s12 }
 0x197   : > { %v571_v1 = vadd.f32 %v570_v0, %v428_v30  ;;  %1998 = vrot.lane.b32.xlu0 %v2592_v60, %s2343_s16  ;;  %1761 = vmatprep.subr.bf16.mxu1 %v1760_v32 }
 0x198   : > { %1763 = vmatpush1.bf16.msra.mxu1 %v1762_v28 }
 0x199   : > { %v574_v38 = vpop.f32.mrb[14].mxu0  ;;  %v2630_v39 = vpack.i.bf16 %v571_v1, %v569_v36 }
 0x19a   : > { %v575_v40 = vadd.f32 %v574_v38, %v433_v37  ;;  %v576_v41 = vpop.f32.mrb[15].mxu0  ;;  %2008 = vrot.lane.b32.xlu1 %v2590_v59, %s2342_s15 }
 0x19b   : > { %v577_v42 = vadd.f32 %v576_v41, %v433_v37  ;;  %2013 = vrot.lane.b32.xlu0 %v2598_v5, %s2337_s10 }
 0x19c   : > { %v1766_v43 = vpack.c.bf16 %v575_v40, %v569_v36  ;;  %v2636_v44 = vpack.i.bf16 %v575_v40, %v569_v36 }
 0x19d   : > { %v1764_v45 = vpack.c.bf16 %v577_v42, %v571_v1  ;;  %v2137_v46 = vpack.i.bf16 %v577_v42, %v575_v40  ;;  %v2147_v47 = vpack.i.bf16 %v577_v42, %v571_v1 }
 0x19e   : > { %2033 = vrot.lane.b32.xlu1 %v2604_v10, %s2341_s14 }
 0x19f   : > { %2018 = vrot.lane.b32.xlu0 %v2598_v5, %s2340_s13  ;;  %1765 = vmatprep.subr.bf16.mxu1 %v1764_v45 }
 0x1a0   : > { %1767 = vmatpush1.bf16.msra.mxu1 %v1766_v43 }
 0x1a2   : > { %2038 = vrot.lane.b32.xlu1 %v2604_v10, %s2343_s16 }
 0x1a3   : > { %2023 = vrot.lane.b32.xlu0 %v2598_v5, %s2339_s12 }
 0x1a6   : > { %2043 = vrot.lane.b32.xlu1 %v2606_v14, %s2337_s10 }
 0x1a7   : > { %2028 = vrot.lane.b32.xlu0 %v2598_v5, %s2342_s15 }
 0x1aa   : > { %2053 = vrot.lane.b32.xlu1 %v2606_v14, %s2340_s13 }
 0x1ab   : > { %2048 = vrot.lane.b32.xlu0 %v2608_v15, %s2341_s14 }
 0x1ae   : > { %2063 = vrot.lane.b32.xlu1 %v2606_v14, %s2339_s12 }
 0x1af   : > { %2058 = vrot.lane.b32.xlu0 %v2608_v15, %s2343_s16 }
 0x1b2   : > { %2068 = vrot.lane.b32.xlu1 %v2606_v14, %s2342_s15 }
 0x1b3   : > { %2073 = vrot.lane.b32.xlu0 %v2614_v23, %s2337_s10 }
 0x1b6   : > { %2088 = vrot.lane.b32.xlu1 %v2620_v29, %s2341_s14 }
 0x1b7   : > { %2078 = vrot.lane.b32.xlu0 %v2614_v23, %s2340_s13 }
 0x1ba   : > { %2093 = vrot.lane.b32.xlu1 %v2620_v29, %s2343_s16 }
 0x1bb   : > { %2083 = vrot.lane.b32.xlu0 %v2614_v23, %s2339_s12 }
 0x1be   : > { %2098 = vrot.lane.b32.xlu1 %v2622_v33, %s2337_s10 }
 0x1bf   : > { %2103 = vrot.lane.b32.xlu0 %v2624_v35, %s2341_s14 }
 0x1c2   : > { %2108 = vrot.lane.b32.xlu1 %v2622_v33, %s2340_s13 }
 0x1c3   : > { %2113 = vrot.lane.b32.xlu0 %v2624_v35, %s2343_s16 }
 0x1c6   : > { %2128 = vrot.lane.b32.xlu1 %v2636_v44, %s2341_s14 }
 0x1c7   : > { %2118 = vrot.lane.b32.xlu0 %v2630_v39, %s2337_s10 }
 0x1ca   : > { %2133 = vrot.lane.b32.xlu1 %v2636_v44, %s2343_s16 }
 0x1cb   : > { %2123 = vrot.lane.b32.xlu0 %v2630_v39, %s2340_s13 }
 0x1ce   : > { %2138 = vrot.lane.b32.xlu1 %v2137_v46, %s2337_s10  ;;  %s3252_s10 = smov 1  }
 0x1cf   : > { %2148 = vrot.lane.b32.xlu0 %v2147_v47, %s2341_s14  ;;  %s3253_s14 = smov 111  }
 0x1d2   : > { %2143 = vrot.lane.b32.xlu1 %v2622_v33, %s2339_s12 }
 0x1d3   : > { %2153 = vrot.lane.b32.xlu0 %v2614_v23, %s2342_s15 }
 0x1d6   : > { %2158 = vrot.lane.b32.xlu1 %v2622_v33, %s2342_s15 }
 0x1d7   : > { %2163 = vrot.lane.b32.xlu0 %v2630_v39, %s2339_s12 }
 0x1da   : > { %2173 = vrot.lane.b32.xlu1 %v2137_v46, %s2340_s13 }
 0x1db   : > { %2168 = vrot.lane.b32.xlu0 %v2630_v39, %s2342_s15 }
 0x1de   : > { %2188 = vrot.lane.b32.xlu1 %v2590_v59, %s3252_s10 }
 0x1df   : > { %2178 = vrot.lane.b32.xlu0 %v2147_v47, %s2343_s16 }
 0x1e2   : > { %2198 = vrot.lane.b32.xlu1 %v2588_v55, %s3253_s14 }
 0x1e3   : > { %2183 = vrot.lane.b32.xlu0 %v2584_v50, %s3252_s10 }
 0x1e6   : > { %2208 = vrot.lane.b32.xlu1 %v2606_v14, %s3252_s10 }
 0x1e7   : > { %2193 = vrot.lane.b32.xlu0 %v2592_v60, %s3253_s14 }
 0x1ea   : > { %2218 = vrot.lane.b32.xlu1 %v2604_v10, %s3253_s14 }
 0x1eb   : > { %2203 = vrot.lane.b32.xlu0 %v2598_v5, %s3252_s10 }
 0x1ee   : > { %2228 = vrot.lane.b32.xlu1 %v2137_v46, %s2339_s12 }
 0x1ef   : > { %2213 = vrot.lane.b32.xlu0 %v2608_v15, %s3253_s14 }
 0x1f2   : > { %2233 = vrot.lane.b32.xlu1 %v2137_v46, %s2342_s15  ;;  %s1434_s15 = scalar_lea.sflag [#allocation3], %s215_s23 }
 0x1f3   : > { %2223 = vrot.lane.b32.xlu0 %v2614_v23, %s3252_s10 }
 0x1f5   : > { %v1954_v49 = vpop.permute.xlu0 %1953 }
 0x1f6   : > { %2238 = vrot.lane.b32.xlu1 %v2622_v33, %s3252_s10  ;;  %v1956_v55 = vunpack.i.h.bf16 %v1954_v49  ;;  %v1955_v56 = vunpack.i.l.bf16 %v1954_v49 }
 0x1f7   : > { %2243 = vrot.lane.b32.xlu0 %v2624_v35, %s3253_s14 }
 0x1f8   : > { %v1974_v50 = vpop.permute.xlu1 %1973  ;;  %v627_v63 = vsel %vm261_vm0, %v1955_v56, %v1956_v55  ;;  %v651_v2 = vsel %vm261_vm0, 0.0, %v1955_v56 }
 0x1f9   : > { %v2730_v52 = vpop.permute.xlu0 %1958  ;;  %v1976_v9 = vunpack.i.h.bf16 %v1974_v50  ;;  %v1975_v10 = vunpack.i.l.bf16 %v1974_v50 }
 0x1fa   : > { %2248 = vrot.lane.b32.xlu1 %v2620_v29, %s3253_s14 }
 0x1fb   : > { %2253 = vrot.lane.b32.xlu0 %v2630_v39, %s3252_s10 }
 0x1fc   : > { %v2736_v53 = vpop.permute.xlu1 %1978 }
 0x1fd   : > { %v1964_v54 = vpop.permute.xlu0 %1963 }
 0x1fe   : > { %2258 = vrot.lane.b32.xlu1 %v2137_v46, %s3252_s10  ;;  %v1966_v12 = vunpack.i.h.bf16 %v1964_v54  ;;  %v1965_v13 = vunpack.i.l.bf16 %v1964_v54  ;;  %s1651_s10 = sshll.u32 %s2399_s22, 8 }
 0x1ff   : > { %2263 = vrot.lane.b32.xlu0 %v2147_v47, %s3253_s14  ;;  %s3190_s26 = scalar_lea.hbm %s3237_s5, %s1651_s10 }
 0x200   : > { %v1984_v57 = vpop.permute.xlu1 %1983  ;;  %v2790_v29 = vsel %vm284_vm4, %v1965_v13, %v1966_v12  ;;  %v2793_v30 = vsel %vm284_vm4, 0.0, %v1965_v13 }
 0x201   : > { %v1986_v59 = vunpack.i.h.bf16 %v1984_v57  ;;  %v1985_v60 = vunpack.i.l.bf16 %v1984_v57  ;;  %v1969_v61 = vpop.permute.xlu0 %1968 }
 0x202   : > { %2268 = vrot.lane.b32.xlu1 %v2636_v44, %s3253_s14  ;;  %v1971_v31 = vunpack.i.h.bf16 %v1969_v61  ;;  %v1970_v32 = vunpack.i.l.bf16 %v1969_v61  ;;  %s217_s14 = scalar_lea.vmem [#allocation2], %s1511_s25 }
 0x203   : > { %v628_v3 = vsel %vm261_vm0, %v1985_v60, %v1986_v59  ;;  %v652_v5 = vsel %vm261_vm0, 0.0, %v1985_v60  ;;  %1211 = vperm.xlu0 %1951, %v1208_v58   ;;  %s1448_s13 = sshll.u32 %s217_s14, 4  ;;  %s3192_s13 = int_to_ptr.vmem [resolvable:$true] %s1448_s13 }
 0x204   : > { %v1660_v22 = vpack.c.bf16 %v628_v3, %v627_v63  ;;  %v1663_v7 = vpack.c.bf16 %v652_v5, %v651_v2  ;;  %v2763_v8 = vpop.permute.xlu1 %1993  ;;  %v2812_v40 = vsel %vm332_vm10, %v1970_v32, %v1971_v31  ;;  %s2273_s22 = scalar_lea.vmem %s3192_s13, 256  ;;  %p2280_p0 = scmp.lt.s32.totalorder %s3192_s13, %s2278_s6 }
 0x205   : > { %v1989_v11 = vpop.permute.xlu0 %1988  ;;  %p2274_p11 = scmp.ne.s32.totalorder %s3192_s13, %s2273_s22  ;;  %p2281_p1 = scmp.lt.s32.totalorder %s2279_s7, %s2273_s22 }
 0x206   : > { %v1991_v14 = vunpack.i.h.bf16 %v1989_v11  ;;  %v1990_v15 = vunpack.i.l.bf16 %v1989_v11  ;;  %1662 = vmatprep.subr.msk.bf16.mxu0 %vm2748_vm14, %v1660_v22 }
 0x207   : > { %1665 = vmatpush1.bf16.msk.msra.mxu0 %vm2759_vm15, %v1663_v7  ;;  %p2275_p12 = pnand %p2274_p11, %p2416_p5  ;;  %p2282_p2 = por %p2281_p1, %p2280_p0 }
 0x208   : > { %v932_v16 = vsel %vm310_vm7, %v1976_v9, %v1991_v14  ;;  %v956_v17 = vsel %vm310_vm7, %v1991_v14, 0.0  ;;  %v931_v18 = vsel %vm310_vm7, %v1975_v10, %v1990_v15  ;;  %v955_v19 = vsel %vm310_vm7, %v1990_v15, 0.0  ;;  %v2004_v21 = vpop.permute.xlu1 %2003 }
 0x209   : > { %v1768_v34 = vpack.c.bf16 %v956_v17, %v955_v19  ;;  %v1771_v24 = vpack.c.bf16 %v932_v16, %v931_v18  ;;  %v2006_v25 = vunpack.i.h.bf16 %v2004_v21  ;;  %v2005_v26 = vunpack.i.l.bf16 %v2004_v21  ;;  %v2787_v28 = vpop.permute.xlu0 %1998  ;;  %p2276_p13 = pneg %p2275_p12 }
 0x20b   : > { %v2796_v27 = vsel %vm284_vm4, %v2005_v26, %v2006_v25  ;;  %v2799_v33 = vsel %vm284_vm4, 0.0, %v2005_v26  ;;  %1770 = vmatprep.subr.msk.bf16.mxu1 %vm2772_vm1, %v1768_v34  ;;  %p2283_p3 = pnand %p2282_p2, %p2276_p13 }
 0x20c   : > { %v1704_v35 = vpack.c.bf16 %v2796_v27, %v2790_v29  ;;  %v1707_v36 = vpack.c.bf16 %v2799_v33, %v2793_v30  ;;  %v2009_v0 = vpop.permute.xlu1 %2008  ;;  %1773 = vmatpush1.bf16.msk.msra.mxu1 %vm2783_vm3, %v1771_v24 }
 0x20d   : > { %v2011_v1 = vunpack.i.h.bf16 %v2009_v0  ;;  %v2010_v37 = vunpack.i.l.bf16 %v2009_v0  ;;  %v2014_v38 = vpop.permute.xlu0 %2013 }
 0x20e   : > { %v2016_v47 = vunpack.i.h.bf16 %v2014_v38  ;;  %v2015_v48 = vunpack.i.l.bf16 %v2014_v38 }
 0x20f   : > { %v2809_v39 = vpack.c.bf16 %v2011_v1, %v1971_v31  ;;  %v2815_v41 = vsel %vm332_vm10, %v2010_v37, %v2011_v1 }
 0x210   : > { %v2034_v42 = vpop.permute.xlu1 %2033  ;;  %v1819_v43 = vpack.c.bf16 %v2815_v41, %v2812_v40  ;;  %v629_v55 = vsel %vm261_vm0, %v2015_v48, %v2016_v47  ;;  %v653_v56 = vsel %vm261_vm0, 0.0, %v2015_v48 }
 0x211   : > { %v2819_v44 = vpop.permute.xlu0 %2018  ;;  %v2036_v2 = vunpack.i.h.bf16 %v2034_v42  ;;  %v2035_v3 = vunpack.i.l.bf16 %v2034_v42 }
 0x214   : > { %v2821_v45 = vpop.permute.xlu1 %2038 }
 0x215   : > { %v2823_v46 = vpop.permute.xlu0 %2023 }
 0x218   : > { %v2044_v49 = vpop.permute.xlu1 %2043 }
 0x219   : > { %v2046_v50 = vunpack.i.h.bf16 %v2044_v49  ;;  %v2045_v51 = vunpack.i.l.bf16 %v2044_v49  ;;  %v2825_v54 = vpop.permute.xlu0 %2028 }
 0x21b   : > { %v630_v57 = vsel %vm261_vm0, %v2045_v51, %v2046_v50  ;;  %v654_v58 = vsel %vm261_vm0, 0.0, %v2045_v51 }
 0x21c   : > { %v1666_v59 = vpack.c.bf16 %v630_v57, %v629_v55  ;;  %v1669_v60 = vpack.c.bf16 %v654_v58, %v653_v56  ;;  %v2831_v61 = vpop.permute.xlu1 %2053 }
 0x21d   : > { %v2049_v63 = vpop.permute.xlu0 %2048 }
 0x21e   : > { %v2051_v5 = vunpack.i.h.bf16 %v2049_v63  ;;  %v2050_v22 = vunpack.i.l.bf16 %v2049_v63  ;;  %1668 = vmatprep.subr.msk.bf16.mxu0 %vm2748_vm14, %v1666_v59 }
 0x21f   : > { %1671 = vmatpush1.bf16.msk.msra.mxu0 %vm2759_vm15, %v1669_v60 }
 0x220   : > { %v934_v7 = vsel %vm310_vm7, %v2036_v2, %v2051_v5  ;;  %v958_v9 = vsel %vm310_vm7, %v2051_v5, 0.0  ;;  %v933_v10 = vsel %vm310_vm7, %v2035_v3, %v2050_v22  ;;  %v957_v11 = vsel %vm310_vm7, %v2050_v22, 0.0  ;;  %v2841_v12 = vpop.permute.xlu1 %2063 }
 0x221   : > { %v1774_v13 = vpack.c.bf16 %v958_v9, %v957_v11  ;;  %v1777_v14 = vpack.c.bf16 %v934_v7, %v933_v10  ;;  %v2843_v15 = vpop.permute.xlu0 %2058  ;;  %v1996_v5 = vunpack.i.h.bf16 %v2763_v8  ;;  %v1995_v22 = vunpack.i.l.bf16 %v2763_v8 }
 0x222   : > { %v1961_v10 = vunpack.i.h.bf16 %v2730_v52  ;;  %v1960_v11 = vunpack.i.l.bf16 %v2730_v52 }
 0x223   : > { %1776 = vmatprep.subr.msk.bf16.mxu1 %vm2772_vm1, %v1774_v13  ;;  %v2001_v13 = vunpack.i.h.bf16 %v2787_v28  ;;  %v708_v8 = vsel %vm276_vm5, %v1995_v22, %v1996_v5 }
 0x224   : > { %v2847_v16 = vpop.permute.xlu1 %2068  ;;  %1779 = vmatpush1.bf16.msk.msra.mxu1 %vm2783_vm3, %v1777_v14  ;;  %v2000_v14 = vunpack.i.l.bf16 %v2787_v28 }
 0x225   : > { %v2074_v17 = vpop.permute.xlu0 %2073 }
 0x226   : > { %v2076_v24 = vunpack.i.h.bf16 %v2074_v17  ;;  %v2075_v25 = vunpack.i.l.bf16 %v2074_v17 }
 0x228   : > { %v2089_v18 = vpop.permute.xlu1 %2088  ;;  %v631_v1 = vsel %vm261_vm0, %v2075_v25, %v2076_v24  ;;  %v655_v47 = vsel %vm261_vm0, 0.0, %v2075_v25  ;;  %v1980_v25 = vunpack.i.l.bf16 %v2736_v53 }
 0x229   : > { %v2851_v19 = vpop.permute.xlu0 %2078  ;;  %v2091_v37 = vunpack.i.h.bf16 %v2089_v18  ;;  %v2090_v48 = vunpack.i.l.bf16 %v2089_v18  ;;  %v1981_v18 = vunpack.i.h.bf16 %v2736_v53  ;;  %v2056_v53 = vunpack.i.h.bf16 %v2831_v61 }
 0x22b   : > { %v2894_v52 = vsel %vm321_vm11, %v1981_v18, %v2001_v13 }
 0x22c   : > { %v2853_v21 = vpop.permute.xlu1 %2093 }
 0x22d   : > { %v2855_v34 = vpop.permute.xlu0 %2083 }
 0x230   : > { %v2099_v26 = vpop.permute.xlu1 %2098 }
 0x231   : > { %v2101_v31 = vunpack.i.h.bf16 %v2099_v26  ;;  %v2100_v32 = vunpack.i.l.bf16 %v2099_v26  ;;  %v2104_v0 = vpop.permute.xlu0 %2103  ;;  %v2890_v26 = vpack.c.bf16 %v1995_v22, %v1960_v11 }
 0x232   : > { %v2106_v38 = vunpack.i.h.bf16 %v2104_v0  ;;  %v2105_v42 = vunpack.i.l.bf16 %v2104_v0 }
 0x233   : > { %v632_v49 = vsel %vm261_vm0, %v2100_v32, %v2101_v31  ;;  %v656_v50 = vsel %vm261_vm0, 0.0, %v2100_v32  ;;  %v707_v31 = vsel %vm276_vm5, %v1960_v11, %v1961_v10  ;;  %v2060_v11 = vunpack.i.l.bf16 %v2843_v15 }
 0x234   : > { %v1672_v51 = vpack.c.bf16 %v632_v49, %v631_v1  ;;  %v1675_v55 = vpack.c.bf16 %v656_v50, %v655_v47  ;;  %v936_v56 = vsel %vm310_vm7, %v2091_v37, %v2106_v38  ;;  %v960_v57 = vsel %vm310_vm7, %v2106_v38, 0.0  ;;  %v2863_v58 = vpop.permute.xlu1 %2108 }
 0x235   : > { %v935_v59 = vsel %vm310_vm7, %v2090_v48, %v2105_v42  ;;  %v959_v60 = vsel %vm310_vm7, %v2105_v42, 0.0  ;;  %v2867_v63 = vpop.permute.xlu0 %2113  ;;  %v1684_v28 = vpack.c.bf16 %v708_v8, %v707_v31  ;;  %v1036_v1 = vsel %vm321_vm11, %v2001_v13, 0.0 }
 0x236   : > { %v1780_v2 = vpack.c.bf16 %v960_v57, %v959_v60  ;;  %v1783_v3 = vpack.c.bf16 %v936_v56, %v935_v59  ;;  %1674 = vmatprep.subr.msk.bf16.mxu0 %vm2748_vm14, %v1672_v51  ;;  %v1035_v37 = vsel %vm321_vm11, %v2000_v14, 0.0  ;;  %v2021_v38 = vunpack.i.h.bf16 %v2819_v44 }
 0x237   : > { %1677 = vmatpush1.bf16.msk.msra.mxu0 %vm2759_vm15, %v1675_v55  ;;  %v2020_v42 = vunpack.i.l.bf16 %v2819_v44  ;;  %v2055_v48 = vunpack.i.l.bf16 %v2831_v61  ;;  %v2095_v31 = vunpack.i.l.bf16 %v2853_v21 }
 0x238   : > { %1782 = vmatprep.subr.msk.bf16.mxu1 %vm2772_vm1, %v1780_v2  ;;  %v2129_v7 = vpop.permute.xlu1 %2128 }
 0x239   : > { %1785 = vmatpush1.bf16.msk.msra.mxu1 %vm2783_vm3, %v1783_v3  ;;  %v2119_v9 = vpop.permute.xlu0 %2118  ;;  %v2131_v55 = vunpack.i.h.bf16 %v2129_v7  ;;  %v2130_v56 = vunpack.i.l.bf16 %v2129_v7  ;;  %v2061_v7 = vunpack.i.h.bf16 %v2843_v15  ;;  %v2111_v15 = vunpack.i.h.bf16 %v2863_v58 }
 0x23a   : > { %v2121_v32 = vunpack.i.h.bf16 %v2119_v9  ;;  %v2120_v0 = vunpack.i.l.bf16 %v2119_v9 }
 0x23c   : > { %v2883_v17 = vpop.permute.xlu1 %2133  ;;  %v633_v60 = vsel %vm261_vm0, %v2120_v0, %v2121_v32  ;;  %v657_v2 = vsel %vm261_vm0, 0.0, %v2120_v0  ;;  %v1011_v32 = vsel %vm321_vm11, %v1980_v25, %v2000_v14  ;;  %v1792_v0 = vpack.c.bf16 %v1036_v1, %v1035_v37 }
 0x23d   : > { %v2887_v24 = vpop.permute.xlu0 %2123  ;;  %v2080_v14 = vunpack.i.l.bf16 %v2851_v19  ;;  %v2116_v25 = vunpack.i.h.bf16 %v2867_v63  ;;  %v2115_v1 = vunpack.i.l.bf16 %v2867_v63  ;;  %v1037_v63 = vsel %vm321_vm11, %v2060_v11, 0.0 }
 0x240   : > { %v2139_v47 = vpop.permute.xlu1 %2138 }
 0x241   : > { %v2141_v49 = vunpack.i.h.bf16 %v2139_v47  ;;  %v2140_v50 = vunpack.i.l.bf16 %v2139_v47  ;;  %v2149_v51 = vpop.permute.xlu0 %2148 }
 0x242   : > { %v2151_v57 = vunpack.i.h.bf16 %v2149_v51  ;;  %v2150_v59 = vunpack.i.l.bf16 %v2149_v51  ;;  %v709_v51 = vsel %vm276_vm5, %v2020_v42, %v2021_v38  ;;  %v2041_v38 = vunpack.i.h.bf16 %v2821_v45 }
 0x243   : > { %v634_v3 = vsel %vm261_vm0, %v2140_v50, %v2141_v49  ;;  %v658_v44 = vsel %vm261_vm0, 0.0, %v2140_v50  ;;  %vm2917_vm0 = vmneg %vm276_vm5  ;;  %v2110_v50 = vunpack.i.l.bf16 %v2863_v58 }
 0x244   : > { %v1678_v5 = vpack.c.bf16 %v634_v3, %v633_v60  ;;  %v1681_v22 = vpack.c.bf16 %v658_v44, %v657_v2  ;;  %v938_v9 = vsel %vm310_vm7, %v2131_v55, %v2151_v57  ;;  %v962_v61 = vsel %vm310_vm7, %v2151_v57, 0.0  ;;  %v2908_v10 = vpop.permute.xlu1 %2143  ;;  %vm2941_vm6 = vmpackc.low %vm2917_vm0, %vm2917_vm0 }
 0x245   : > { %v937_v13 = vsel %vm310_vm7, %v2130_v56, %v2150_v59  ;;  %v961_v8 = vsel %vm310_vm7, %v2150_v59, 0.0  ;;  %v2914_v18 = vpop.permute.xlu0 %2153  ;;  %v710_v55 = vsel %vm276_vm5, %v2055_v48, %v2056_v53  ;;  %v2081_v56 = vunpack.i.h.bf16 %v2851_v19 }
 0x246   : > { %v1786_v47 = vpack.c.bf16 %v962_v61, %v961_v8  ;;  %v1789_v49 = vpack.c.bf16 %v938_v9, %v937_v13  ;;  %1680 = vmatprep.subr.msk.bf16.mxu0 %vm2748_vm14, %v1678_v5  ;;  %v2040_v19 = vunpack.i.l.bf16 %v2821_v45  ;;  %v1038_v53 = vsel %vm321_vm11, %v2061_v7, 0.0 }
 0x247   : > { %1683 = vmatpush1.bf16.msk.msra.mxu0 %vm2759_vm15, %v1681_v22  ;;  %v2026_v59 = vunpack.i.h.bf16 %v2823_v46  ;;  %v1689_v60 = vpack.c.bf16 %v710_v55, %v709_v51  ;;  %v1691_v2 = vpack.c.bf16 %v2055_v48, %v2020_v42  ;;  %v1014_v45 = vsel %vm321_vm11, %v2041_v38, %v2061_v7 }
 0x248   : > { %1788 = vmatprep.subr.msk.bf16.mxu1 %vm2772_vm1, %v1786_v47  ;;  %v2936_v37 = vpop.permute.xlu1 %2158  ;;  %1685 = vmatprep.subr.bf16.mxu0 %v1684_v28  ;;  %v1795_v28 = vpack.c.bf16 %v2894_v52, %v1011_v32  ;;  %v1013_v3 = vsel %vm321_vm11, %v2040_v19, %v2060_v11  ;;  %v712_v44 = vsel %vm276_vm5, %v2110_v50, %v2111_v15  ;;  %v1040_v52 = vsel %vm321_vm11, %v2116_v25, 0.0 }
 0x249   : > { %1791 = vmatpush1.bf16.msk.msra.mxu1 %vm2783_vm3, %v1789_v49  ;;  %v2951_v57 = vpop.permute.xlu0 %2163  ;;  %v1798_v5 = vpack.c.bf16 %v1038_v53, %v1037_v63  ;;  %v1039_v22 = vsel %vm321_vm11, %v2115_v1, 0.0  ;;  %v711_v61 = vsel %vm276_vm5, %v2080_v14, %v2081_v56  ;;  %v2126_v42 = vunpack.i.h.bf16 %v2887_v24 }
 0x24a   : > { %1794 = vmatprep.subr.msk.bf16.mxu1 %vm2748_vm14, %v1792_v0  ;;  %v2125_v48 = vunpack.i.l.bf16 %v2887_v24  ;;  %v2025_v13 = vunpack.i.l.bf16 %v2823_v46  ;;  %v2096_v8 = vunpack.i.h.bf16 %v2853_v21  ;;  %v1694_v32 = vpack.c.bf16 %v712_v44, %v711_v61 }
 0x24b   : > { %1688 = vmatpush1.bf16.msk.msra.mxu0 %vm2941_vm6, %v2890_v26  ;;  %v2066_v0 = vunpack.i.h.bf16 %v2841_v12  ;;  %v2065_v24 = vunpack.i.l.bf16 %v2841_v12  ;;  %v1801_v47 = vpack.c.bf16 %v1014_v45, %v1013_v3  ;;  %v2031_v15 = vunpack.i.h.bf16 %v2825_v54 }
 0x24c   : > { %v2174_v9 = vpop.permute.xlu1 %2173  ;;  %1690 = vmatprep.subr.bf16.mxu0 %v1689_v60  ;;  %v1016_v51 = vsel %vm321_vm11, %v2096_v8, %v2116_v25  ;;  %v1015_v21 = vsel %vm321_vm11, %v2095_v31, %v2115_v1  ;;  %v1804_v55 = vpack.c.bf16 %v1040_v52, %v1039_v22  ;;  %v2030_v38 = vunpack.i.l.bf16 %v2825_v54 }
 0x24d   : > { %v2176_v7 = vunpack.i.h.bf16 %v2174_v9  ;;  %v2175_v11 = vunpack.i.l.bf16 %v2174_v9  ;;  %1797 = vmatpush1.bf16.msk.msra.mxu1 %vm2759_vm15, %v1795_v28  ;;  %v2970_v26 = vpop.permute.xlu0 %2168  ;;  %v1696_v19 = vpack.c.bf16 %v2110_v50, %v2080_v14  ;;  %v2136_v12 = vunpack.i.h.bf16 %v2883_v17 }
 0x24e   : > { %1800 = vmatprep.subr.msk.bf16.mxu1 %vm2748_vm14, %v1798_v5  ;;  %v713_v63 = vsel %vm276_vm5, %v2125_v48, %v2126_v42  ;;  %v2135_v28 = vunpack.i.l.bf16 %v2883_v17  ;;  %v2997_v54 = vsel %vm284_vm4, 0.0, %v2065_v24  ;;  %v2071_v50 = vunpack.i.h.bf16 %v2847_v16 }
 0x24f   : > { %1693 = vmatpush1.bf16.msk.msra.mxu0 %vm2941_vm6, %v1691_v2  ;;  %v714_v49 = vsel %vm276_vm5, %v2175_v11, %v2176_v7  ;;  %v774_v2 = vsel %vm284_vm4, %v2065_v24, %v2066_v0  ;;  %v1807_v14 = vpack.c.bf16 %v1016_v51, %v1015_v21  ;;  %v2070_v52 = vunpack.i.l.bf16 %v2847_v16  ;;  %vm3024_vm5 = vmpackc.low %vm332_vm10, %vm332_vm10 }
 0x250   : > { %v2985_v56 = vpop.permute.xlu1 %2188  ;;  %1695 = vmatprep.subr.bf16.mxu0 %v1694_v32  ;;  %v1699_v1 = vpack.c.bf16 %v714_v49, %v713_v63  ;;  %v1701_v22 = vpack.c.bf16 %v2175_v11, %v2125_v48  ;;  %v773_v7 = vsel %vm284_vm4, %v2025_v13, %v2026_v59  ;;  %v797_v8 = vsel %vm284_vm4, 0.0, %v2025_v13 }
 0x251   : > { %1803 = vmatpush1.bf16.msk.msra.mxu1 %vm2759_vm15, %v1801_v47  ;;  %v2179_v53 = vpop.permute.xlu0 %2178  ;;  %v2146_v31 = vunpack.i.h.bf16 %v2908_v10  ;;  %v2145_v32 = vunpack.i.l.bf16 %v2908_v10  ;;  %v1710_v0 = vpack.c.bf16 %v774_v2, %v773_v7  ;;  %v1713_v16 = vpack.c.bf16 %v2997_v54, %v797_v8 }
 0x252   : > { %v2181_v25 = vunpack.i.h.bf16 %v2179_v53  ;;  %v2180_v60 = vunpack.i.l.bf16 %v2179_v53  ;;  %1806 = vmatprep.subr.msk.bf16.mxu1 %vm2748_vm14, %v1804_v55  ;;  %v1093_v59 = vsel %vm332_vm10, %v2030_v38, %v2031_v15  ;;  %v2086_v48 = vunpack.i.h.bf16 %v2855_v34 }
 0x253   : > { %1698 = vmatpush1.bf16.msk.msra.mxu0 %vm2941_vm6, %v1696_v19  ;;  %v2085_v10 = vunpack.i.l.bf16 %v2855_v34  ;;  %v2161_v11 = vunpack.i.h.bf16 %v2936_v37  ;;  %v2160_v58 = vunpack.i.l.bf16 %v2936_v37  ;;  %v1821_v24 = vpack.c.bf16 %v2071_v50, %v2031_v15 }
 0x254   : > { %v1018_v45 = vsel %vm321_vm11, %v2136_v12, %v2181_v25  ;;  %v1042_v17 = vsel %vm321_vm11, %v2181_v25, 0.0  ;;  %v1017_v3 = vsel %vm321_vm11, %v2135_v28, %v2180_v60  ;;  %v1041_v44 = vsel %vm321_vm11, %v2180_v60, 0.0  ;;  %v3006_v5 = vpop.permute.xlu1 %2198  ;;  %1700 = vmatprep.subr.bf16.mxu0 %v1699_v1 }
 0x255   : > { %v1810_v9 = vpack.c.bf16 %v1042_v17, %v1041_v44  ;;  %v1813_v61 = vpack.c.bf16 %v1018_v45, %v1017_v3  ;;  %1809 = vmatpush1.bf16.msk.msra.mxu1 %vm2759_vm15, %v1807_v14  ;;  %v2184_v42 = vpop.permute.xlu0 %2183  ;;  %v2156_v47 = vunpack.i.h.bf16 %v2914_v18  ;;  %v2155_v49 = vunpack.i.l.bf16 %v2914_v18 }
 0x256   : > { %v1094_v37 = vsel %vm332_vm10, %v2070_v52, %v2071_v50  ;;  %v776_v51 = vsel %vm284_vm4, %v2145_v32, %v2146_v31  ;;  %v800_v21 = vsel %vm284_vm4, 0.0, %v2145_v32  ;;  %v2166_v29 = vunpack.i.h.bf16 %v2951_v57 }
 0x257   : > { %1703 = vmatpush1.bf16.msk.msra.mxu0 %vm2941_vm6, %v1701_v22  ;;  %1812 = vmatprep.subr.msk.bf16.mxu1 %vm2748_vm14, %v1810_v9  ;;  %v2165_v27 = vunpack.i.l.bf16 %v2951_v57  ;;  %v2170_v18 = vunpack.i.l.bf16 %v2970_v26  ;;  %v2186_v15 = vunpack.i.h.bf16 %v2184_v42  ;;  %v2185_v55 = vunpack.i.l.bf16 %v2184_v42 }
 0x258   : > { %v3033_v13 = vpop.permute.xlu1 %2208  ;;  %1706 = vmatprep.subr.msk.bf16.mxu0 %vm2772_vm1, %v1704_v35  ;;  %v2171_v35 = vunpack.i.h.bf16 %v2970_v26  ;;  %v775_v38 = vsel %vm284_vm4, %v2085_v10, %v2086_v48  ;;  %v799_v57 = vsel %vm284_vm4, 0.0, %v2085_v10  ;;  %v1096_v12 = vsel %vm332_vm10, %v2160_v58, %v2161_v11 }
 0x259   : > { %1815 = vmatpush1.bf16.msk.msra.mxu1 %vm2759_vm15, %v1813_v61  ;;  %v3044_v34 = vpop.permute.xlu0 %2193  ;;  %v1716_v53 = vpack.c.bf16 %v776_v51, %v775_v38  ;;  %v1719_v63 = vpack.c.bf16 %v800_v21, %v799_v57  ;;  %v1826_v28 = vpack.c.bf16 %v2161_v11, %v2156_v47  ;;  %v1095_v33 = vsel %vm332_vm10, %v2155_v49, %v2156_v47 }
 0x25a   : > { %1818 = vmatprep.subr.msk.bf16.mxu1 %vm3024_vm5, %v2809_v39  ;;  %v1824_v39 = vpack.c.bf16 %v1094_v37, %v1093_v59  ;;  %v801_v25 = vsel %vm284_vm4, 0.0, %v2165_v27  ;;  %v2191_v60 = vunpack.i.h.bf16 %v2985_v56  ;;  %v2190_v1 = vunpack.i.l.bf16 %v2985_v56 }
 0x25b   : > { %1709 = vmatpush1.bf16.msk.msra.mxu0 %vm2783_vm3, %v1707_v36  ;;  %v777_v36 = vsel %vm284_vm4, %v2165_v27, %v2166_v29  ;;  %v851_v2 = vsel %vm299_vm2, %v2185_v55, %v2186_v15  ;;  %v3080_v54 = vsel %vm299_vm2, 0.0, %v2185_v55  ;;  %v1829_v40 = vpack.c.bf16 %v1096_v12, %v1095_v33 }
 0x25c   : > { %v3063_v19 = vpop.permute.xlu1 %2218  ;;  %1712 = vmatprep.subr.msk.bf16.mxu0 %vm2772_vm1, %v1710_v0  ;;  %v1097_v41 = vsel %vm332_vm10, %v2170_v18, %v2171_v35  ;;  %v2210_v56 = vunpack.i.l.bf16 %v3033_v13  ;;  %v2196_v50 = vunpack.i.h.bf16 %v3044_v34  ;;  %v2195_v14 = vunpack.i.l.bf16 %v3044_v34 }
 0x25d   : > { %1820 = vmatpush1.bf16.msra.mxu1 %v1819_v43  ;;  %v2204_v30 = vpop.permute.xlu0 %2203  ;;  %v2211_v43 = vunpack.i.h.bf16 %v3033_v13  ;;  %v852_v9 = vsel %vm299_vm2, %v2190_v1, %v2191_v60  ;;  %v876_v61 = vsel %vm299_vm2, 0.0, %v2190_v1  ;;  %v2201_v42 = vunpack.i.h.bf16 %v3006_v5 }
 0x25e   : > { %1823 = vmatprep.subr.msk.bf16.mxu1 %vm3024_vm5, %v1821_v24  ;;  %v2206_v17 = vunpack.i.h.bf16 %v2204_v30  ;;  %v2205_v3 = vunpack.i.l.bf16 %v2204_v30  ;;  %v2200_v7 = vunpack.i.l.bf16 %v3006_v5  ;;  %v1728_v8 = vpack.c.bf16 %v852_v9, %v851_v2 }
 0x25f   : > { %1715 = vmatpush1.bf16.msk.msra.mxu0 %vm2783_vm3, %v1713_v16  ;;  %v1731_v31 = vpack.c.bf16 %v876_v61, %v3080_v54  ;;  %v1180_v16 = vsel %vm340_vm12, %v2196_v50, 0.0  ;;  %v1179_v59 = vsel %vm340_vm12, %v2195_v14, 0.0  ;;  %v854_v11 = vsel %vm299_vm2, %v2210_v56, %v2211_v43 }
 0x260   : > { %v2229_v45 = vpop.permute.xlu1 %2228  ;;  %1718 = vmatprep.subr.msk.bf16.mxu0 %vm2772_vm1, %v1716_v53  ;;  %v853_v58 = vsel %vm299_vm2, %v2205_v3, %v2206_v17  ;;  %v1156_v49 = vsel %vm340_vm12, %v2201_v42, %v2196_v50  ;;  %v1155_v34 = vsel %vm340_vm12, %v2200_v7, %v2195_v14  ;;  %v1836_v21 = vpack.c.bf16 %v1180_v16, %v1179_v59 }
 0x261   : > { %v2231_v44 = vunpack.i.h.bf16 %v2229_v45  ;;  %v2230_v52 = vunpack.i.l.bf16 %v2229_v45  ;;  %1825 = vmatpush1.bf16.msra.mxu1 %v1824_v39  ;;  %v2214_v22 = vpop.permute.xlu0 %2213  ;;  %v2221_v29 = vunpack.i.h.bf16 %v3063_v19  ;;  %v2220_v15 = vunpack.i.l.bf16 %v3063_v19 }
 0x262   : > { %1828 = vmatprep.subr.msk.bf16.mxu1 %vm3024_vm5, %v1826_v28  ;;  %v2216_v37 = vunpack.i.h.bf16 %v2214_v22  ;;  %v2215_v51 = vunpack.i.l.bf16 %v2214_v22  ;;  %v877_v55 = vsel %vm299_vm2, 0.0, %v2205_v3  ;;  %v1734_v38 = vpack.c.bf16 %v854_v11, %v853_v58 }
 0x263   : > { %v778_v32 = vsel %vm284_vm4, %v2230_v52, %v2231_v44  ;;  %v802_v0 = vsel %vm284_vm4, 0.0, %v2230_v52  ;;  %1721 = vmatpush1.bf16.msk.msra.mxu0 %vm2783_vm3, %v1719_v63  ;;  %v1839_v46 = vpack.c.bf16 %v1156_v49, %v1155_v34 }
 0x264   : > { %v1722_v48 = vpack.c.bf16 %v778_v32, %v777_v36  ;;  %v1725_v10 = vpack.c.bf16 %v802_v0, %v801_v25  ;;  %v2234_v5 = vpop.permute.xlu1 %2233  ;;  %v1182_v28 = vsel %vm340_vm12, %v2216_v37, 0.0  ;;  %v1181_v19 = vsel %vm340_vm12, %v2215_v51, 0.0  ;;  %v1205_v36 = vld [vmem:[%s3235_s3 + $0x10] sm:$0xff] }
 0x265   : > { %v2236_v13 = vunpack.i.h.bf16 %v2234_v5  ;;  %v2235_v24 = vunpack.i.l.bf16 %v2234_v5  ;;  %1830 = vmatpush1.bf16.msra.mxu1 %v1829_v40  ;;  %v2224_v47 = vpop.permute.xlu0 %2223  ;;  %v878_v25 = vsel %vm299_vm2, 0.0, %v2210_v56  ;;  %v1158_v2 = vsel %vm340_vm12, %v2221_v29, %v2216_v37 }
 0x266   : > { %1724 = vmatprep.subr.msk.bf16.mxu0 %vm2772_vm1, %v1722_v48  ;;  %v2226_v12 = vunpack.i.h.bf16 %v2224_v47  ;;  %v2225_v53 = vunpack.i.l.bf16 %v2224_v47  ;;  %v1737_v1 = vpack.c.bf16 %v878_v25, %v877_v55  ;;  %v1157_v54 = vsel %vm340_vm12, %v2220_v15, %v2215_v51  ;;  %v1203_v15 = vld [vmem:[%s3235_s3] sm:$0xff] }
 0x267   : > { %v1831_v27 = vpack.c.bf16 %v2236_v13, %v2171_v35  ;;  %1727 = vmatpush1.bf16.msk.msra.mxu0 %vm2783_vm3, %v1725_v10  ;;  %v1098_v18 = vsel %vm332_vm10, %v2235_v24, %v2236_v13  ;;  %v1845_v42 = vpack.c.bf16 %v1158_v2, %v1157_v54  ;;  %v1207_v55 = vld [vmem:[%s3235_s3 + $0x20] sm:$0xff] }
 0x268   : > { %v2239_v57 = vpop.permute.xlu1 %2238  ;;  %1730 = vmatprep.subr.msk.bf16.mxu0 %vm2748_vm14, %v1728_v8  ;;  %v1834_v39 = vpack.c.bf16 %v1098_v18, %v1097_v41  ;;  %v1842_v41 = vpack.c.bf16 %v1182_v28, %v1181_v19  ;;  %v855_v43 = vsel %vm299_vm2, %v2225_v53, %v2226_v12  ;;  %v879_v7 = vsel %vm299_vm2, 0.0, %v2225_v53 }
 0x269   : > { %v2241_v63 = vunpack.i.h.bf16 %v2239_v57  ;;  %v2240_v26 = vunpack.i.l.bf16 %v2239_v57  ;;  %v2244_v35 = vpop.permute.xlu0 %2243  ;;  %1833 = vmatprep.subr.msk.bf16.mxu1 %vm3024_vm5, %v1831_v27 }
 0x26a   : > { %v2246_v30 = vunpack.i.h.bf16 %v2244_v35  ;;  %v2245_v33 = vunpack.i.l.bf16 %v2244_v35  ;;  %1835 = vmatpush1.bf16.msra.mxu1 %v1834_v39 }
 0x26b   : > { %v856_v60 = vsel %vm299_vm2, %v2240_v26, %v2241_v63  ;;  %1733 = vmatpush1.bf16.msk.msra.mxu0 %vm2759_vm15, %v1731_v31  ;;  %1838 = vmatprep.subr.msk.bf16.mxu1 %vm2772_vm1, %v1836_v21  ;;  %v880_v45 = vsel %vm299_vm2, 0.0, %v2240_v26 }
 0x26c   : > { %v2249_v40 = vpop.permute.xlu1 %2248  ;;  %1736 = vmatprep.subr.msk.bf16.mxu0 %vm2748_vm14, %v1734_v38  ;;  %v1740_v17 = vpack.c.bf16 %v856_v60, %v855_v43  ;;  %v1184_v3 = vsel %vm340_vm12, %v2246_v30, 0.0  ;;  %v1183_v44 = vsel %vm340_vm12, %v2245_v33, 0.0 }
 0x26d   : > { %v2251_v56 = vunpack.i.h.bf16 %v2249_v40  ;;  %v2250_v50 = vunpack.i.l.bf16 %v2249_v40  ;;  %v2254_v14 = vpop.permute.xlu0 %2253  ;;  %1354 = vmatmul.mubr.f32.vlgmr.msra.gmra.mrb[0].mxu1 %v1205_v36  ;;  %v1848_v31 = vpack.c.bf16 %v1184_v3, %v1183_v44 }
 0x26e   : > { %1841 = vmatpush1.bf16.msk.msra.mxu1 %vm2783_vm3, %v1839_v46  ;;  %1424 = vmatprep.mubr.f32.mxu1 %v2345_v4  ;;  %v2256_v9 = vunpack.i.h.bf16 %v2254_v14  ;;  %v2255_v61 = vunpack.i.l.bf16 %v2254_v14  ;;  %v1743_v4 = vpack.c.bf16 %v880_v45, %v879_v7 }
 0x26f   : > { %v1159_v52 = vsel %vm340_vm12, %v2250_v50, %v2245_v33  ;;  %v1160_v22 = vsel %vm340_vm12, %v2251_v56, %v2246_v30  ;;  %1739 = vmatpush1.bf16.msk.msra.mxu0 %vm2759_vm15, %v1737_v1  ;;  %1844 = vmatprep.subr.msk.bf16.mxu1 %vm2772_vm1, %v1842_v41 }
 0x270   : > { %v2259_v8 = vpop.permute.xlu1 %2258  ;;  %1742 = vmatprep.subr.msk.bf16.mxu0 %vm2748_vm14, %v1740_v17  ;;  %v1851_v59 = vpack.c.bf16 %v1160_v22, %v1159_v52  ;;  %v857_v5 = vsel %vm299_vm2, %v2255_v61, %v2256_v9  ;;  %v881_v11 = vsel %vm299_vm2, 0.0, %v2255_v61 }
 0x271   : > { %v2261_v32 = vunpack.i.h.bf16 %v2259_v8  ;;  %v2260_v0 = vunpack.i.l.bf16 %v2259_v8  ;;  %v2264_v16 = vpop.permute.xlu0 %2263 }
 0x272   : > { %v2266_v48 = vunpack.i.h.bf16 %v2264_v16  ;;  %v2265_v10 = vunpack.i.l.bf16 %v2264_v16  ;;  %1847 = vmatpush1.bf16.msk.msra.mxu1 %vm2783_vm3, %v1845_v42 }
 0x273   : > { %v858_v58 = vsel %vm299_vm2, %v2260_v0, %v2261_v32  ;;  %v882_v13 = vsel %vm299_vm2, 0.0, %v2260_v0  ;;  %1745 = vmatpush1.bf16.msk.msra.mxu0 %vm2759_vm15, %v1743_v4  ;;  %1850 = vmatprep.subr.msk.bf16.mxu1 %vm2772_vm1, %v1848_v31  ;;  %vm1214_vm2 = vcmask 523264  }
 0x274   : > { %v1746_v24 = vpack.c.bf16 %v858_v58, %v857_v5  ;;  %v1749_v47 = vpack.c.bf16 %v882_v13, %v881_v11  ;;  %v1186_v49 = vsel %vm340_vm12, %v2266_v48, 0.0  ;;  %v1185_v34 = vsel %vm340_vm12, %v2265_v10, 0.0  ;;  %v2269_v37 = vpop.permute.xlu1 %2268 }
 0x275   : > { %v1854_v51 = vpack.c.bf16 %v1186_v49, %v1185_v34  ;;  %v2271_v21 = vunpack.i.h.bf16 %v2269_v37  ;;  %v2270_v29 = vunpack.i.l.bf16 %v2269_v37 }
 0x276   : > { %1748 = vmatprep.subr.msk.bf16.mxu0 %vm2748_vm14, %v1746_v24  ;;  %1853 = vmatpush1.bf16.msk.msra.mxu1 %vm2783_vm3, %v1851_v59 }
 0x277   : > { %v1161_v27 = vsel %vm340_vm12, %v2270_v29, %v2265_v10  ;;  %v1162_v18 = vsel %vm340_vm12, %v2271_v21, %v2266_v48  ;;  %1751 = vmatpush1.bf16.msk.msra.mxu0 %vm2759_vm15, %v1749_v47  ;;  %1856 = vmatprep.subr.msk.bf16.mxu1 %vm2772_vm1, %v1854_v51 }
 0x278   : > { %v1857_v62 = vpack.c.bf16 %v1162_v18, %v1161_v27 }
 0x27a   : > { %1283 = vmatmul.mubr.f32.vlgmr.msra.gmra.mrb[16].mxu0 %v1203_v15  ;;  %1859 = vmatpush1.bf16.msk.msra.mxu1 %vm2783_vm3, %v1857_v62 }
 0x27d   : > { %1644 = vmatmul.mubr.msk.f32.vlgmr.msra.gmra.mrb[0].mxu1 %vm1214_vm2, %v1207_v55 }
 0x282   : > { %v1212_v6 = vpop.permute.xlu0 %1211 }
 0x34d   : > { %v1284_v20 = vpop.f32.mrb[16].mxu0 }
 0x34e   : > { %v1285_v38 = vadd.f32 %v1284_v20, %v1212_v6  ;;  %v1286_v57 = vpop.f32.mrb[17].mxu0 }
 0x34f   : > { %v1287_v39 = vadd.f32 %v1286_v57, %v1212_v6 }
 0x350   : > { %v1426_v12 = vpop.f32.mrb[0].mxu1 }
 0x351   : > { %v1861_v23 = vadd.f32 %v1426_v12, %v1285_v38  ;;  %v1428_v53 = vpop.f32.mrb[1].mxu1 }
 0x352   : > { %v1863_v63 = vadd.f32 %v1428_v53, %v1287_v39 }
 0x353   : > { %1431 = vst [vmem:[%s217_s14] sm:$0xff] %v1861_v23 }
 0x354   : > { %1432 = vst [vmem:[%s217_s14 + $0x8] sm:$0xff] %v1863_v63 }
 0x355   : > { %2286 = shalt.err (!%p2283_p3)
}
 0x356   : > { %s2287_s11 = scalar_lea.hbm %s3190_s26, 256  ;;  %s2291_s9 = scalar_lea.hbm %s3237_s5, 512 }
 0x357   : > { %p2288_p4 = scmp.ne.s32.totalorder %s3190_s26, %s2287_s11  ;;  %p2292_p9 = scmp.lt.u32.totalorder %s3190_s26, %s3237_s5 }
 0x358   : > { %p2293_p10 = scmp.lt.u32.totalorder %s2291_s9, %s2287_s11  ;;  %p2295_p12 = scmp.lt.u32.totalorder %s2287_s11, %s3190_s26 }
 0x359   : > { %p2289_p7 = pnand %p2288_p4, %p2416_p5 }
 0x35a   : > { %p2294_p11 = por %p2293_p10, %p2292_p9 }
 0x35b   : > { %p2290_p8 = pneg %p2289_p7 }
 0x35c   : > { %p2296_p13 = por %p2295_p12, %p2294_p11 }
 0x35e   : > { %p2297_p0 = pnand %p2296_p13, %p2290_p8 }
 0x360   : > { %2300 = shalt.err (!%p2297_p0)
}
 0x361   : > { %1866 = dma.vmem_to_hbm [thread:$0]  (%p2416_p5), %s3192_s13, 256, %s3190_s26, %s1434_s15  }
 0x362 PF: > { %p1872_p1 = scmp.ge.s32.totalorder %s2335_s21, 2  ;;  %s1460_s10 = sand.u32 1, %s2323_s18  }
 0x363   : > { %s1461_s14 = scalar_lea.sflag [#allocation3], %s1460_s10 }
 0x364   : > { %p1869_p2 = pnand %p1872_p1, %p2420_p6 }
 0x366   : > { %2318 = dma.done.wait (!%p1869_p2), %s1461_s14, 256  }
 0x367   : > { %2320 = vsyncadd (!%p1869_p2), %s1461_s14, 4294967040  ;;  %p15_p3 = scmp.ge.s32.totalorder %s2403_s24, 4   ;;  %s3268_s18 = smov %s2327_s19 }
 0x368   : > { %s3269_s19 = smov %s2331_s20  ;;  %s3270_s20 = smov %s2414_s27 }
 0x369   : > { %s3271_s21 = smov %s2403_s24  ;;  %17 = sbr.rel (!%p15_p3) target bundleno = 3 (0x3), region = 75 }
 0x370   :  { %1466 = vsyncpa [#allocation3], 1 }
 0x371   :  { %1468 = vsyncpa [#allocation3 + $0x1], 1 }

</bundles_post_ra>
